<compile_context>
chip_gen: v7x
topology: tpu7x:2x2x1
jax: 0.10.0
libtpu: 0.0.40
codegen_flags: <defaults>
</compile_context>

<pallas_src>
import functools
import math
import numpy as np

import jax
import jax.numpy as jnp
from jax.experimental import pallas as pl
from jax.experimental.pallas import tpu as pltpu


# ----------------------------- in-kernel helpers -----------------------------

def _mm(a, b):
    return jnp.dot(a, b, preferred_element_type=jnp.float32)


def _layer_norm(x, g, b, eps=1e-5):
    mean = jnp.mean(x, axis=-1, keepdims=True)
    var = jnp.mean(jnp.square(x - mean), axis=-1, keepdims=True)
    return (x - mean) * jax.lax.rsqrt(var + eps) * g + b


def _head_sum(x, num_heads, head_dim):
    """(rows, E) -> (rows, H): sum each head's contiguous dh-lane block (VPU/XLU)."""
    cols = [jnp.sum(x[:, h * head_dim:(h + 1) * head_dim], axis=-1, keepdims=True)
            for h in range(num_heads)]
    return cols[0] if num_heads == 1 else jnp.concatenate(cols, axis=-1)


def _head_expand(p, num_heads, head_dim):
    """(rows, H) -> (rows, H*dh): broadcast each head prob over its dh lanes (VPU)."""
    rows = p.shape[0]
    cols = [jnp.broadcast_to(p[:, h:h + 1], (rows, head_dim)) for h in range(num_heads)]
    return cols[0] if num_heads == 1 else jnp.concatenate(cols, axis=-1)


# ----------------------------- fused encoder kernel -----------------------------

def _encoder_kernel(num_heads,
                    x_ref, wqkv_ref, wo_ref, w1_ref, w2_ref, vec_ref,
                    whead_ref, bhead_ref,
                    enc_ref, mulv_ref):
    layer = pl.program_id(0)
    n_layers = pl.num_programs(0)
    B, S, E = enc_ref.shape           # B is the attention "sequence" (batch_first mismatch)
    H = num_heads
    dh = E // H
    Hd = w1_ref.shape[1]

    @pl.when(layer == 0)
    def _():
        enc_ref[...] = x_ref[...]     # embeddings(+PE) -> residual stream lives in the output block

    vec = vec_ref[...]                # all per-layer vectors arrive in one DMA
    b_qkv = vec[0:1, :3 * E]
    b_o = vec[1:2, :E]
    ln1_g, ln1_b = vec[2:3, :E], vec[3:4, :E]
    b_1 = vec[4:5, :Hd]
    b_2 = vec[5:6, :E]
    ln2_g, ln2_b = vec[6:7, :E], vec[7:8, :E]

    xf = enc_ref[...].reshape(B * S, E)            # rows ordered (i, s)
    qkv = _mm(xf, wqkv_ref[...]) + b_qkv           # one fused QKV matmul for every row
    q, k, v = qkv[:, :E], qkv[:, E:2 * E], qkv[:, 2 * E:3 * E]

    # Self-attention over the length-B "sequence"; scores / probs per head on the
    # VPU (no tiny 2-lane MXU matmuls).  1/sqrt(dh) is folded into wq/bq.
    ctx_list = []
    for i in range(B):
        q_i = q[i * S:(i + 1) * S, :]
        s_list = [_head_sum(q_i * k[j * S:(j + 1) * S, :], H, dh) for j in range(B)]
        m = s_list[0]
        for s_ij in s_list[1:]:
            m = jnp.maximum(m, s_ij)
        e_list = [jnp.exp(s_ij - m) for s_ij in s_list]
        den = e_list[0]
        for e_ij in e_list[1:]:
            den = den + e_ij
        inv = pl.reciprocal(den, approx=True)      # EUP slot, frees the VALU
        ctx_i = None
        for j in range(B):
            contrib = _head_expand(e_list[j] * inv, H, dh) * v[j * S:(j + 1) * S, :]
            ctx_i = contrib if ctx_i is None else ctx_i + contrib
        ctx_list.append(ctx_i)
    ctx = jnp.concatenate(ctx_list, axis=0)        # (B*S, E)

    attn = _mm(ctx, wo_ref[...]) + b_o             # single out-proj matmul for all rows
    y = _layer_norm(xf + attn, ln1_g, ln1_b)
    hdn = jnp.maximum(_mm(y, w1_ref[...]) + b_1, 0.0)
    ff = _mm(hdn, w2_ref[...]) + b_2
    out = _layer_norm(y + ff, ln2_g, ln2_b)
    out3 = out.reshape(B, S, E)
    enc_ref[...] = out3

    @pl.when(layer == n_layers - 1)
    def _():
        pooled = jnp.mean(out3, axis=1)            # encoded_src.mean(dim=1) -> (B, E)
        # mu || logvar packed into one lane-dense (B, 128) store
        mulv_ref[...] = _mm(pooled, whead_ref[...]) + bhead_ref[...]


# ----------------------------- fused decoder kernel -----------------------------

def _decoder_kernel(num_heads,
                    z_ref, mem_ref, l2e_ref, l2eb_ref,
                    w_ref, w1_ref, w2_ref, vec_ref,
                    wout_ref, bout_ref,
                    logits_ref,
                    tgt_ref, ctx_ref):
    layer = pl.program_id(0)
    n_layers = pl.num_programs(0)
    B, E = tgt_ref.shape
    S = mem_ref.shape[1]
    H = num_heads
    dh = E // H
    Hd = w1_ref.shape[1]

    @pl.when(layer == 0)
    def _():
        # latent_to_embedding(z).unsqueeze(0) + pe[:1]; bias+pe pre-folded; dropout = eval identity
        tgt_ref[...] = _mm(z_ref[...], l2e_ref[...]) + l2eb_ref[...]

    w = w_ref[...]                    # [sa_wv | sa_wo | ca_wq | ca_wk | ca_wv | ca_wo]
    sa_wv, sa_wo = w[:, :E], w[:, E:2 * E]
    ca_wq, ca_wkv, ca_wo = w[:, 2 * E:3 * E], w[:, 3 * E:5 * E], w[:, 5 * E:6 * E]

    vec = vec_ref[...]
    sa_bv, sa_bo = vec[0:1, :E], vec[1:2, :E]
    ln1_g, ln1_b = vec[2:3, :E], vec[3:4, :E]
    ca_bq, ca_bkv = vec[4:5, :E], vec[5:6, :2 * E]
    ca_bo = vec[6:7, :E]
    ln2_g, ln2_b = vec[7:8, :E], vec[8:9, :E]
    b_1, b_2 = vec[9:10, :Hd], vec[10:11, :E]
    ln3_g, ln3_b = vec[11:12, :E], vec[12:13, :E]

    x = tgt_ref[...]                  # (B, E): tgt sequence length is 1

    # --- self-attention: single key -> softmax == 1 -> exactly out_proj(v_proj(x)) ---
    v_sa = _mm(x, sa_wv) + sa_bv
    x = _layer_norm(x + _mm(v_sa, sa_wo) + sa_bo, ln1_g, ln1_b)

    # --- cross-attention over memory: K/V projected ONCE for the whole memory ---
    mem_flat = mem_ref[...].reshape(B * S, E)
    kv = _mm(mem_flat, ca_wkv) + ca_bkv            # fused (B*S, 2E) K|V projection
    q = _mm(x, ca_wq) + ca_bq                      # 1/sqrt(dh) folded into ca_wq/ca_bq
    for b in range(B):
        k_b = kv[b * S:(b + 1) * S, :E]
        v_b = kv[b * S:(b + 1) * S, E:2 * E]
        s_b = _head_sum(k_b * q[b:b + 1, :], H, dh)            # (S, H) on the VPU
        m_b = jnp.max(s_b, axis=0, keepdims=True)
        p_b = jnp.exp(s_b - m_b)
        p_b = p_b * pl.reciprocal(jnp.sum(p_b, axis=0, keepdims=True), approx=True)
        ctx_b = jnp.sum(_head_expand(p_b, H, dh) * v_b, axis=0, keepdims=True)
        ctx_ref[b:b + 1, :] = ctx_b                # direct per-row store (no O(B^2) selects)
    x = _layer_norm(x + _mm(ctx_ref[...], ca_wo) + ca_bo, ln2_g, ln2_b)

    # --- feed-forward ---
    hdn = jnp.maximum(_mm(x, w1_ref[...]) + b_1, 0.0)
    x = _layer_norm(x + _mm(hdn, w2_ref[...]) + b_2, ln3_g, ln3_b)
    tgt_ref[...] = x

    @pl.when(layer == n_layers - 1)
    def _():
        # fc_out, lane-padded to a multiple of 128 -> single dense store
        logits_ref[...] = _mm(x, wout_ref[...]) + bout_ref[...]


# ----------------------------- pallas_call wrappers -----------------------------

def _per_layer(a, b):
    return pl.BlockSpec((pl.Squeezed(), a, b), lambda l: (l, 0, 0))


def _const2(a, b):
    return pl.BlockSpec((a, b), lambda l: (0, 0))


def _const3(a, b, c):
    return pl.BlockSpec((a, b, c), lambda l: (0, 0, 0))


def _encode(prep, x, num_heads):
    enc = prep['enc']
    n_layers, E, E3 = enc['w_qkv'].shape
    B, S, _ = x.shape
    Hd = enc['w1'].shape[2]
    NV, W = enc['vec'].shape[1], enc['vec'].shape[2]
    Hp = prep['whead'].shape[1]
    grid_spec = pltpu.PrefetchScalarGridSpec(
        num_scalar_prefetch=0, grid=(n_layers,),
        in_specs=[
            _const3(B, S, E),
            _per_layer(E, E3), _per_layer(E, E),
            _per_layer(E, Hd), _per_layer(Hd, E),
            _per_layer(NV, W),
            _const2(E, Hp), _const2(1, Hp),
        ],
        out_specs=(_const3(B, S, E), _const2(B, Hp)),
    )
    return pl.pallas_call(
        functools.partial(_encoder_kernel, num_heads),
        grid_spec=grid_spec,
        out_shape=(jax.ShapeDtypeStruct((B, S, E), jnp.float32),
                   jax.ShapeDtypeStruct((B, Hp), jnp.float32)),
        compiler_params=pltpu.CompilerParams(dimension_semantics=("arbitrary",)),
    )(x, enc['w_qkv'], enc['w_o'], enc['w1'], enc['w2'], enc['vec'],
      prep['whead'], prep['bhead'])


def _decode(prep, z, memory, num_heads):
    dec = prep['dec']
    n_layers, E, _ = dec['w'].shape
    B, S, _ = memory.shape
    Ld = z.shape[1]
    Hd = dec['w1'].shape[2]
    NV, W = dec['vec'].shape[1], dec['vec'].shape[2]
    Vpad = prep['fc_outT'].shape[1]
    grid_spec = pltpu.PrefetchScalarGridSpec(
        num_scalar_prefetch=0, grid=(n_layers,),
        in_specs=[
            _const2(B, Ld), _const3(B, S, E),
            _const2(Ld, E), _const2(1, E),
            _per_layer(E, 6 * E),
            _per_layer(E, Hd), _per_layer(Hd, E),
            _per_layer(NV, W),
            _const2(E, Vpad), _const2(1, Vpad),
        ],
        out_specs=_const2(B, Vpad),
        scratch_shapes=[pltpu.VMEM((B, E), jnp.float32),   # resident tgt stream
                        pltpu.VMEM((B, E), jnp.float32)],  # cross-attn ctx rows
    )
    return pl.pallas_call(
        functools.partial(_decoder_kernel, num_heads),
        grid_spec=grid_spec,
        out_shape=jax.ShapeDtypeStruct((B, Vpad), jnp.float32),
        compiler_params=pltpu.CompilerParams(dimension_semantics=("arbitrary",)),
    )(z, memory, prep['l2eT'], prep['l2e_bias_pe'],
      dec['w'], dec['w1'], dec['w2'], dec['vec'],
      prep['fc_outT'], prep['fc_out_b'])


# ----------------------------- params: init + one-time prepare -----------------------------

def build_pe(max_len, d_model):
    position = np.arange(max_len, dtype=np.float32)[:, None]
    div_term = np.exp(np.arange(0, d_model, 2, dtype=np.float32)
                      * -(math.log(10000.0) / d_model))
    pe = np.zeros((max_len, 1, d_model), np.float32)
    pe[:, 0, 0::2] = np.sin(position * div_term)
    pe[:, 0, 1::2] = np.cos(position * div_term)
    return jnp.asarray(pe)


def init_params(key, vocab_size, embedding_dim, hidden_dim, latent_dim,
                num_layers, num_heads, max_len=500):
    E, H, L = embedding_dim, hidden_dim, latent_dim
    keys = iter(jax.random.split(key, 16 + num_layers * 64))

    def w(shape, scale=0.05):
        return scale * jax.random.normal(next(keys), shape, jnp.float32)

    def attn():
        return dict(wq=w((E, E)), wk=w((E, E)), wv=w((E, E)),
                    bq=w((E,), 0.01), bk=w((E,), 0.01), bv=w((E,), 0.01),
                    wo=w((E, E)), bo=w((E,), 0.01))

    def enc_layer():
        return dict(self_attn=attn(),
                    ln1_g=jnp.ones((E,), jnp.float32), ln1_b=jnp.zeros((E,), jnp.float32),
                    lin1_w=w((H, E)), lin1_b=w((H,), 0.01),
                    lin2_w=w((E, H)), lin2_b=w((E,), 0.01),
                    ln2_g=jnp.ones((E,), jnp.float32), ln2_b=jnp.zeros((E,), jnp.float32))

    def dec_layer():
        d = enc_layer()
        d.update(cross_attn=attn(),
                 ln3_g=jnp.ones((E,), jnp.float32), ln3_b=jnp.zeros((E,), jnp.float32))
        return d

    return dict(
        embedding=w((vocab_size, E), 0.1),
        pe=build_pe(max_len, E),
        enc_layers=[enc_layer() for _ in range(num_layers)],
        dec_layers=[dec_layer() for _ in range(num_layers)],
        fc_mu_w=w((L, E)), fc_mu_b=w((L,), 0.01),
        fc_logvar_w=w((L, E)), fc_logvar_b=w((L,), 0.01),
        lat2emb_w=w((E, L)), lat2emb_b=w((E,), 0.01),
        fc_out_w=w((vocab_size, E)), fc_out_b=w((vocab_size,), 0.01),
    )


def prepare_params(params, num_heads, lane=128):
    """One-time conversion into the fused-kernel layout: pre-transposed weights,
    Q|K|V (and decoder attn) matrices concatenated, all per-layer vectors packed
    into one tensor per layer stack, 1/sqrt(head_dim) folded into the q weights,
    mu||logvar head and fc_out lane-padded to multiples of 128."""
    E = params['embedding'].shape[1]
    vocab = params['fc_out_w'].shape[0]
    Hd = params['enc_layers'][0]['lin1_w'].shape[0]
    Ld = params['fc_mu_w'].shape[0]
    assert E % num_heads == 0
    dh = E // num_heads
    scale = 1.0 / math.sqrt(dh)

    def f32(a):
        return jnp.asarray(a, jnp.float32)

    def enc_pack(p):
        a = p['self_attn']
        w_qkv = jnp.concatenate([f32(a['wq']).T * scale, f32(a['wk']).T, f32(a['wv']).T], axis=1)
        vec = jnp.zeros((8, max(3 * E, Hd)), jnp.float32)
        vec = vec.at[0, :3 * E].set(jnp.concatenate(
            [f32(a['bq']) * scale, f32(a['bk']), f32(a['bv'])]))
        vec = vec.at[1, :E].set(f32(a['bo']))
        vec = vec.at[2, :E].set(f32(p['ln1_g']))
        vec = vec.at[3, :E].set(f32(p['ln1_b']))
        vec = vec.at[4, :Hd].set(f32(p['lin1_b']))
        vec = vec.at[5, :E].set(f32(p['lin2_b']))
        vec = vec.at[6, :E].set(f32(p['ln2_g']))
        vec = vec.at[7, :E].set(f32(p['ln2_b']))
        return dict(w_qkv=w_qkv, w_o=f32(a['wo']).T,
                    w1=f32(p['lin1_w']).T, w2=f32(p['lin2_w']).T, vec=vec)

    def dec_pack(p):
        sa, ca = p['self_attn'], p['cross_attn']
        w = jnp.concatenate([f32(sa['wv']).T, f32(sa['wo']).T,
                             f32(ca['wq']).T * scale, f32(ca['wk']).T,
                             f32(ca['wv']).T, f32(ca['wo']).T], axis=1)
        vec = jnp.zeros((13, max(2 * E, Hd)), jnp.float32)
        vec = vec.at[0, :E].set(f32(sa['bv']))
        vec = vec.at[1, :E].set(f32(sa['bo']))
        vec = vec.at[2, :E].set(f32(p['ln1_g']))
        vec = vec.at[3, :E].set(f32(p['ln1_b']))
        vec = vec.at[4, :E].set(f32(ca['bq']) * scale)
        vec = vec.at[5, :2 * E].set(jnp.concatenate([f32(ca['bk']), f32(ca['bv'])]))
        vec = vec.at[6, :E].set(f32(ca['bo']))
        vec = vec.at[7, :E].set(f32(p['ln2_g']))
        vec = vec.at[8, :E].set(f32(p['ln2_b']))
        vec = vec.at[9, :Hd].set(f32(p['lin1_b']))
        vec = vec.at[10, :E].set(f32(p['lin2_b']))
        vec = vec.at[11, :E].set(f32(p['ln3_g']))
        vec = vec.at[12, :E].set(f32(p['ln3_b']))
        return dict(w=w, w1=f32(p['lin1_w']).T, w2=f32(p['lin2_w']).T, vec=vec)

    def stack_dicts(ds):
        return {k: jnp.stack([d[k] for d in ds], 0) for k in ds[0]}

    enc = stack_dicts([enc_pack(p) for p in params['enc_layers']])
    dec = stack_dicts([dec_pack(p) for p in params['dec_layers']])

    # mu || logvar head, lane-padded to `lane`
    hp = max(lane, ((2 * Ld + lane - 1) // lane) * lane)
    whead = jnp.zeros((E, hp), jnp.float32)
    whead = whead.at[:, :Ld].set(f32(params['fc_mu_w']).T)
    whead = whead.at[:, Ld:2 * Ld].set(f32(params['fc_logvar_w']).T)
    bhead = jnp.zeros((1, hp), jnp.float32)
    bhead = bhead.at[0, :Ld].set(f32(params['fc_mu_b']))
    bhead = bhead.at[0, Ld:2 * Ld].set(f32(params['fc_logvar_b']))

    vpad = ((vocab + lane - 1) // lane) * lane
    fc_outT = jnp.zeros((E, vpad), jnp.float32).at[:, :vocab].set(f32(params['fc_out_w']).T)
    fc_out_b = jnp.zeros((1, vpad), jnp.float32).at[0, :vocab].set(f32(params['fc_out_b']))

    pe = f32(params['pe'])
    return dict(
        embedding=f32(params['embedding']),
        pe=pe,                                      # (max_len, 1, E)
        enc=enc, dec=dec,
        whead=whead, bhead=bhead,
        l2eT=f32(params['lat2emb_w']).T,            # (Ld, E)
        l2e_bias_pe=f32(params['lat2emb_b'])[None, :] + pe[0],   # bias + pe[0] folded
        fc_outT=fc_outT, fc_out_b=fc_out_b,
    )


# ----------------------------- forward -----------------------------

@functools.partial(jax.jit, static_argnames=("vocab_size", "num_heads"))
def transformer_vae_forward(prep, src, eps_key=None, z=None, *, vocab_size, num_heads):
    E = prep['embedding'].shape[1]
    Ld = prep['l2eT'].shape[0]
    B = src.shape[0]
    # nn.Embedding gather + sqrt(E) scale + PositionalEncoding (pe indexed along
    # dim0 = batch, exactly as the reference's batch_first mismatch does).
    # TODO(synk): fold the gather into the encoder's layer-0 step via scalar prefetch.
    x = (prep['embedding'][src] * math.sqrt(E) + prep['pe'][:B]).astype(jnp.float32)
    encoded, mulv = _encode(prep, x, num_heads)
    mu, logvar = mulv[:, :Ld], mulv[:, Ld:2 * Ld]
    if z is None:
        # Reference reparameterize(): std = exp(0.5*logvar) is computed but the
        # function returns mu + eps (eps ~ N(0,1)); reproduced as-is.
        eps = jax.random.normal(eps_key, mu.shape, jnp.float32)
        z = mu + eps
    logits_pad = _decode(prep, z.astype(jnp.float32), encoded, num_heads)
    logits = logits_pad[:, :vocab_size][None, :, :]            # (1, B, vocab)
    return logits, mu, logvar


# ----------------------------- main -----------------------------

if __name__ == "__main__":
    vocab_size, embedding_dim, hidden_dim, latent_dim = 50, 32, 64, 16
    num_layers, num_heads = 2, 2
    B, S = 2, 8

    key = jax.random.PRNGKey(0)
    pkey, skey, ekey = jax.random.split(key, 3)

    params = init_params(pkey, vocab_size, embedding_dim, hidden_dim,
                         latent_dim, num_layers, num_heads)
    prep = prepare_params(params, num_heads)   # one-time transpose / fuse / pack / pad

    src = jax.random.randint(skey, (B, S), 0, vocab_size, dtype=jnp.int32)

    logits, mu, logvar = transformer_vae_forward(prep, src, ekey,
                                                 vocab_size=vocab_size,
                                                 num_heads=num_heads)
    jax.block_until_ready((logits, mu, logvar))

    assert logits.shape == (1, B, vocab_size)
    assert mu.shape == (B, latent_dim)
    assert logvar.shape == (B, latent_dim)
    assert bool(jnp.all(jnp.isfinite(logits)))
    assert bool(jnp.all(jnp.isfinite(mu))) and bool(jnp.all(jnp.isfinite(logvar)))
    print("KERNEL_OK")
</pallas_src>

<mosaic_0001>
module attributes {stable_mosaic.version = 11 : i64} {
  func.func @_encoder_kernel(%arg0: i32, %arg1: memref<2x8x32xf32, #tpu.memory_space<vmem>>, %arg2: memref<1x32x96xf32, #tpu.memory_space<vmem>>, %arg3: memref<1x32x32xf32, #tpu.memory_space<vmem>>, %arg4: memref<1x32x64xf32, #tpu.memory_space<vmem>>, %arg5: memref<1x64x32xf32, #tpu.memory_space<vmem>>, %arg6: memref<1x8x96xf32, #tpu.memory_space<vmem>>, %arg7: memref<32x128xf32, #tpu.memory_space<vmem>>, %arg8: memref<1x128xf32, #tpu.memory_space<vmem>>, %arg9: memref<2x8x32xf32, #tpu.memory_space<vmem>>, %arg10: memref<2x128xf32, #tpu.memory_space<vmem>>) attributes {dimension_semantics = [#tpu.dimension_semantics<arbitrary>], iteration_bounds = array<i64: 2>, scalar_prefetch = 0 : i64, scratch_operands = 0 : i64, tpu.core_type = #tpu.core_type<tc>, window_params = [{pipeline_mode = #tpu.pipeline_mode<synchronous>, transform_indices = @transform_0, window_bounds = array<i64: 2, 8, 32>}, {transform_indices = @transform_1, window_bounds = array<i64: 1, 32, 96>}, {transform_indices = @transform_2, window_bounds = array<i64: 1, 32, 32>}, {transform_indices = @transform_3, window_bounds = array<i64: 1, 32, 64>}, {transform_indices = @transform_4, window_bounds = array<i64: 1, 64, 32>}, {transform_indices = @transform_5, window_bounds = array<i64: 1, 8, 96>}, {pipeline_mode = #tpu.pipeline_mode<synchronous>, transform_indices = @transform_6, window_bounds = array<i64: 32, 128>}, {pipeline_mode = #tpu.pipeline_mode<synchronous>, transform_indices = @transform_7, window_bounds = array<i64: 1, 128>}, {pipeline_mode = #tpu.pipeline_mode<synchronous>, transform_indices = @transform_8, window_bounds = array<i64: 2, 8, 32>}, {pipeline_mode = #tpu.pipeline_mode<synchronous>, transform_indices = @transform_9, window_bounds = array<i64: 2, 128>}]} {
    %c0_i32 = arith.constant 0 : i32
    %0 = arith.cmpi eq, %arg0, %c0_i32 : i32
    %1 = arith.extui %0 : i1 to i32
    %c0_i32_0 = arith.constant 0 : i32
    %2 = arith.cmpi ne, %1, %c0_i32_0 : i32
    scf.if %2 {
      %c0_44 = arith.constant 0 : index
      %c0_45 = arith.constant 0 : index
      %c0_46 = arith.constant 0 : index
      %186 = vector.load %arg1[%c0_44, %c0_45, %c0_46] : memref<2x8x32xf32, #tpu.memory_space<vmem>>, vector<2x8x32xf32>
      %c0_47 = arith.constant 0 : index
      %c0_48 = arith.constant 0 : index
      %c0_49 = arith.constant 0 : index
      %187 = vector.load %arg9[%c0_47, %c0_48, %c0_49] : memref<2x8x32xf32, #tpu.memory_space<vmem>>, vector<2x8x32xf32>
      tpu.vector_store %arg9[%c0_47, %c0_48, %c0_49], %186 {strides = array<i32>} : memref<2x8x32xf32, #tpu.memory_space<vmem>>, vector<2x8x32xf32>,
    } else {
    }
    %c0 = arith.constant 0 : index
    %c0_1 = arith.constant 0 : index
    %c0_2 = arith.constant 0 : index
    %3 = vector.load %arg6[%c0, %c0_1, %c0_2] : memref<1x8x96xf32, #tpu.memory_space<vmem>>, vector<1x8x96xf32>
    %4 = vector.shape_cast %3 : vector<1x8x96xf32> to vector<8x96xf32>
    %5 = vector.extract_strided_slice %4 {offsets = [0, 0], sizes = [1, 96], strides = [1, 1]} : vector<8x96xf32> to vector<1x96xf32>
    %6 = vector.extract_strided_slice %4 {offsets = [1, 0], sizes = [1, 32], strides = [1, 1]} : vector<8x96xf32> to vector<1x32xf32>
    %7 = vector.extract_strided_slice %4 {offsets = [2, 0], sizes = [1, 32], strides = [1, 1]} : vector<8x96xf32> to vector<1x32xf32>
    %8 = vector.extract_strided_slice %4 {offsets = [3, 0], sizes = [1, 32], strides = [1, 1]} : vector<8x96xf32> to vector<1x32xf32>
    %9 = vector.extract_strided_slice %4 {offsets = [4, 0], sizes = [1, 64], strides = [1, 1]} : vector<8x96xf32> to vector<1x64xf32>
    %10 = vector.extract_strided_slice %4 {offsets = [5, 0], sizes = [1, 32], strides = [1, 1]} : vector<8x96xf32> to vector<1x32xf32>
    %11 = vector.extract_strided_slice %4 {offsets = [6, 0], sizes = [1, 32], strides = [1, 1]} : vector<8x96xf32> to vector<1x32xf32>
    %12 = vector.extract_strided_slice %4 {offsets = [7, 0], sizes = [1, 32], strides = [1, 1]} : vector<8x96xf32> to vector<1x32xf32>
    %c0_3 = arith.constant 0 : index
    %c0_4 = arith.constant 0 : index
    %c0_5 = arith.constant 0 : index
    %13 = vector.load %arg9[%c0_3, %c0_4, %c0_5] : memref<2x8x32xf32, #tpu.memory_space<vmem>>, vector<2x8x32xf32>
    %14 = vector.shape_cast %13 : vector<2x8x32xf32> to vector<16x32xf32>
    %c0_6 = arith.constant 0 : index
    %c0_7 = arith.constant 0 : index
    %c0_8 = arith.constant 0 : index
    %15 = vector.load %arg2[%c0_6, %c0_7, %c0_8] : memref<1x32x96xf32, #tpu.memory_space<vmem>>, vector<1x32x96xf32>
    %16 = vector.shape_cast %15 : vector<1x32x96xf32> to vector<32x96xf32>
    %cst = arith.constant dense<0.000000e+00> : vector<16x96xf32>
    %17 = tpu.matmul %14, %16, %cst {dimension_numbers = #tpu.dot_dimension_numbers<[1], [0], [0], [1], [0, 0, 1, 1], [], []>} : vector<16x32xf32>, vector<32x96xf32>, vector<16x96xf32> -> vector<16x96xf32>
    %18 = vector.broadcast %5 : vector<1x96xf32> to vector<16x96xf32>
    %19 = arith.addf %17, %18 : vector<16x96xf32>
    %20 = vector.extract_strided_slice %19 {offsets = [0, 0], sizes = [16, 32], strides = [1, 1]} : vector<16x96xf32> to vector<16x32xf32>
    %21 = vector.extract_strided_slice %19 {offsets = [0, 32], sizes = [16, 32], strides = [1, 1]} : vector<16x96xf32> to vector<16x32xf32>
    %22 = vector.extract_strided_slice %19 {offsets = [0, 64], sizes = [16, 32], strides = [1, 1]} : vector<16x96xf32> to vector<16x32xf32>
    %23 = vector.extract_strided_slice %20 {offsets = [0, 0], sizes = [8, 32], strides = [1, 1]} : vector<16x32xf32> to vector<8x32xf32>
    %24 = vector.extract_strided_slice %21 {offsets = [0, 0], sizes = [8, 32], strides = [1, 1]} : vector<16x32xf32> to vector<8x32xf32>
    %25 = arith.mulf %23, %24 : vector<8x32xf32>
    %26 = vector.extract_strided_slice %25 {offsets = [0, 0], sizes = [8, 16], strides = [1, 1]} : vector<8x32xf32> to vector<8x16xf32>
    %cst_9 = arith.constant dense<0.000000e+00> : vector<8xf32>
    %27 = vector.multi_reduction <add>, %26, %cst_9 [1] : vector<8x16xf32> to vector<8xf32>
    %28 = vector.shape_cast %27 : vector<8xf32> to vector<8x1xf32>
    %29 = vector.extract_strided_slice %25 {offsets = [0, 16], sizes = [8, 16], strides = [1, 1]} : vector<8x32xf32> to vector<8x16xf32>
    %cst_10 = arith.constant dense<0.000000e+00> : vector<8xf32>
    %30 = vector.multi_reduction <add>, %29, %cst_10 [1] : vector<8x16xf32> to vector<8xf32>
    %31 = vector.shape_cast %30 : vector<8xf32> to vector<8x1xf32>
    %32 = tpu.concatenate %28, %31 in 1 : vector<8x1xf32>, vector<8x1xf32> -> vector<8x2xf32>
    %33 = vector.extract_strided_slice %21 {offsets = [8, 0], sizes = [8, 32], strides = [1, 1]} : vector<16x32xf32> to vector<8x32xf32>
    %34 = arith.mulf %23, %33 : vector<8x32xf32>
    %35 = vector.extract_strided_slice %34 {offsets = [0, 0], sizes = [8, 16], strides = [1, 1]} : vector<8x32xf32> to vector<8x16xf32>
    %cst_11 = arith.constant dense<0.000000e+00> : vector<8xf32>
    %36 = vector.multi_reduction <add>, %35, %cst_11 [1] : vector<8x16xf32> to vector<8xf32>
    %37 = vector.shape_cast %36 : vector<8xf32> to vector<8x1xf32>
    %38 = vector.extract_strided_slice %34 {offsets = [0, 16], sizes = [8, 16], strides = [1, 1]} : vector<8x32xf32> to vector<8x16xf32>
    %cst_12 = arith.constant dense<0.000000e+00> : vector<8xf32>
    %39 = vector.multi_reduction <add>, %38, %cst_12 [1] : vector<8x16xf32> to vector<8xf32>
    %40 = vector.shape_cast %39 : vector<8xf32> to vector<8x1xf32>
    %41 = tpu.concatenate %37, %40 in 1 : vector<8x1xf32>, vector<8x1xf32> -> vector<8x2xf32>
    %42 = arith.maximumf %32, %41 : vector<8x2xf32>
    %43 = arith.subf %32, %42 : vector<8x2xf32>
    %44 = math.exp %43 : vector<8x2xf32>
    %45 = arith.subf %41, %42 : vector<8x2xf32>
    %46 = math.exp %45 : vector<8x2xf32>
    %47 = arith.addf %44, %46 : vector<8x2xf32>
    %48 = tpu.reciprocal %47 {approx = true} : vector<8x2xf32> -> vector<8x2xf32>
    %49 = arith.mulf %44, %48 : vector<8x2xf32>
    %50 = vector.extract_strided_slice %49 {offsets = [0, 0], sizes = [8, 1], strides = [1, 1]} : vector<8x2xf32> to vector<8x1xf32>
    %51 = vector.shape_cast %50 : vector<8x1xf32> to vector<8x1xf32>
    %52 = vector.broadcast %51 : vector<8x1xf32> to vector<8x16xf32>
    %53 = vector.extract_strided_slice %49 {offsets = [0, 1], sizes = [8, 1], strides = [1, 1]} : vector<8x2xf32> to vector<8x1xf32>
    %54 = vector.shape_cast %53 : vector<8x1xf32> to vector<8x1xf32>
    %55 = vector.broadcast %54 : vector<8x1xf32> to vector<8x16xf32>
    %56 = tpu.concatenate %52, %55 in 1 : vector<8x16xf32>, vector<8x16xf32> -> vector<8x32xf32>
    %57 = vector.extract_strided_slice %22 {offsets = [0, 0], sizes = [8, 32], strides = [1, 1]} : vector<16x32xf32> to vector<8x32xf32>
    %58 = arith.mulf %56, %57 : vector<8x32xf32>
    %59 = arith.mulf %46, %48 : vector<8x2xf32>
    %60 = vector.extract_strided_slice %59 {offsets = [0, 0], sizes = [8, 1], strides = [1, 1]} : vector<8x2xf32> to vector<8x1xf32>
    %61 = vector.shape_cast %60 : vector<8x1xf32> to vector<8x1xf32>
    %62 = vector.broadcast %61 : vector<8x1xf32> to vector<8x16xf32>
    %63 = vector.extract_strided_slice %59 {offsets = [0, 1], sizes = [8, 1], strides = [1, 1]} : vector<8x2xf32> to vector<8x1xf32>
    %64 = vector.shape_cast %63 : vector<8x1xf32> to vector<8x1xf32>
    %65 = vector.broadcast %64 : vector<8x1xf32> to vector<8x16xf32>
    %66 = tpu.concatenate %62, %65 in 1 : vector<8x16xf32>, vector<8x16xf32> -> vector<8x32xf32>
    %67 = vector.extract_strided_slice %22 {offsets = [8, 0], sizes = [8, 32], strides = [1, 1]} : vector<16x32xf32> to vector<8x32xf32>
    %68 = arith.mulf %66, %67 : vector<8x32xf32>
    %69 = arith.addf %58, %68 : vector<8x32xf32>
    %70 = vector.extract_strided_slice %20 {offsets = [8, 0], sizes = [8, 32], strides = [1, 1]} : vector<16x32xf32> to vector<8x32xf32>
    %71 = vector.extract_strided_slice %21 {offsets = [0, 0], sizes = [8, 32], strides = [1, 1]} : vector<16x32xf32> to vector<8x32xf32>
    %72 = arith.mulf %70, %71 : vector<8x32xf32>
    %73 = vector.extract_strided_slice %72 {offsets = [0, 0], sizes = [8, 16], strides = [1, 1]} : vector<8x32xf32> to vector<8x16xf32>
    %cst_13 = arith.constant dense<0.000000e+00> : vector<8xf32>
    %74 = vector.multi_reduction <add>, %73, %cst_13 [1] : vector<8x16xf32> to vector<8xf32>
    %75 = vector.shape_cast %74 : vector<8xf32> to vector<8x1xf32>
    %76 = vector.extract_strided_slice %72 {offsets = [0, 16], sizes = [8, 16], strides = [1, 1]} : vector<8x32xf32> to vector<8x16xf32>
    %cst_14 = arith.constant dense<0.000000e+00> : vector<8xf32>
    %77 = vector.multi_reduction <add>, %76, %cst_14 [1] : vector<8x16xf32> to vector<8xf32>
    %78 = vector.shape_cast %77 : vector<8xf32> to vector<8x1xf32>
    %79 = tpu.concatenate %75, %78 in 1 : vector<8x1xf32>, vector<8x1xf32> -> vector<8x2xf32>
    %80 = vector.extract_strided_slice %21 {offsets = [8, 0], sizes = [8, 32], strides = [1, 1]} : vector<16x32xf32> to vector<8x32xf32>
    %81 = arith.mulf %70, %80 : vector<8x32xf32>
    %82 = vector.extract_strided_slice %81 {offsets = [0, 0], sizes = [8, 16], strides = [1, 1]} : vector<8x32xf32> to vector<8x16xf32>
    %cst_15 = arith.constant dense<0.000000e+00> : vector<8xf32>
    %83 = vector.multi_reduction <add>, %82, %cst_15 [1] : vector<8x16xf32> to vector<8xf32>
    %84 = vector.shape_cast %83 : vector<8xf32> to vector<8x1xf32>
    %85 = vector.extract_strided_slice %81 {offsets = [0, 16], sizes = [8, 16], strides = [1, 1]} : vector<8x32xf32> to vector<8x16xf32>
    %cst_16 = arith.constant dense<0.000000e+00> : vector<8xf32>
    %86 = vector.multi_reduction <add>, %85, %cst_16 [1] : vector<8x16xf32> to vector<8xf32>
    %87 = vector.shape_cast %86 : vector<8xf32> to vector<8x1xf32>
    %88 = tpu.concatenate %84, %87 in 1 : vector<8x1xf32>, vector<8x1xf32> -> vector<8x2xf32>
    %89 = arith.maximumf %79, %88 : vector<8x2xf32>
    %90 = arith.subf %79, %89 : vector<8x2xf32>
    %91 = math.exp %90 : vector<8x2xf32>
    %92 = arith.subf %88, %89 : vector<8x2xf32>
    %93 = math.exp %92 : vector<8x2xf32>
    %94 = arith.addf %91, %93 : vector<8x2xf32>
    %95 = tpu.reciprocal %94 {approx = true} : vector<8x2xf32> -> vector<8x2xf32>
    %96 = arith.mulf %91, %95 : vector<8x2xf32>
    %97 = vector.extract_strided_slice %96 {offsets = [0, 0], sizes = [8, 1], strides = [1, 1]} : vector<8x2xf32> to vector<8x1xf32>
    %98 = vector.shape_cast %97 : vector<8x1xf32> to vector<8x1xf32>
    %99 = vector.broadcast %98 : vector<8x1xf32> to vector<8x16xf32>
    %100 = vector.extract_strided_slice %96 {offsets = [0, 1], sizes = [8, 1], strides = [1, 1]} : vector<8x2xf32> to vector<8x1xf32>
    %101 = vector.shape_cast %100 : vector<8x1xf32> to vector<8x1xf32>
    %102 = vector.broadcast %101 : vector<8x1xf32> to vector<8x16xf32>
    %103 = tpu.concatenate %99, %102 in 1 : vector<8x16xf32>, vector<8x16xf32> -> vector<8x32xf32>
    %104 = vector.extract_strided_slice %22 {offsets = [0, 0], sizes = [8, 32], strides = [1, 1]} : vector<16x32xf32> to vector<8x32xf32>
    %105 = arith.mulf %103, %104 : vector<8x32xf32>
    %106 = arith.mulf %93, %95 : vector<8x2xf32>
    %107 = vector.extract_strided_slice %106 {offsets = [0, 0], sizes = [8, 1], strides = [1, 1]} : vector<8x2xf32> to vector<8x1xf32>
    %108 = vector.shape_cast %107 : vector<8x1xf32> to vector<8x1xf32>
    %109 = vector.broadcast %108 : vector<8x1xf32> to vector<8x16xf32>
    %110 = vector.extract_strided_slice %106 {offsets = [0, 1], sizes = [8, 1], strides = [1, 1]} : vector<8x2xf32> to vector<8x1xf32>
    %111 = vector.shape_cast %110 : vector<8x1xf32> to vector<8x1xf32>
    %112 = vector.broadcast %111 : vector<8x1xf32> to vector<8x16xf32>
    %113 = tpu.concatenate %109, %112 in 1 : vector<8x16xf32>, vector<8x16xf32> -> vector<8x32xf32>
    %114 = vector.extract_strided_slice %22 {offsets = [8, 0], sizes = [8, 32], strides = [1, 1]} : vector<16x32xf32> to vector<8x32xf32>
    %115 = arith.mulf %113, %114 : vector<8x32xf32>
    %116 = arith.addf %105, %115 : vector<8x32xf32>
    %117 = tpu.concatenate %69, %116 in 0 : vector<8x32xf32>, vector<8x32xf32> -> vector<16x32xf32>
    %c0_17 = arith.constant 0 : index
    %c0_18 = arith.constant 0 : index
    %c0_19 = arith.constant 0 : index
    %118 = vector.load %arg3[%c0_17, %c0_18, %c0_19] : memref<1x32x32xf32, #tpu.memory_space<vmem>>, vector<1x32x32xf32>
    %119 = vector.shape_cast %118 : vector<1x32x32xf32> to vector<32x32xf32>
    %cst_20 = arith.constant dense<0.000000e+00> : vector<16x32xf32>
    %120 = tpu.matmul %117, %119, %cst_20 {dimension_numbers = #tpu.dot_dimension_numbers<[1], [0], [0], [1], [0, 0, 1, 1], [], []>} : vector<16x32xf32>, vector<32x32xf32>, vector<16x32xf32> -> vector<16x32xf32>
    %121 = vector.broadcast %6 : vector<1x32xf32> to vector<16x32xf32>
    %122 = arith.addf %120, %121 : vector<16x32xf32>
    %123 = arith.addf %14, %122 : vector<16x32xf32>
    %cst_21 = arith.constant dense<0.000000e+00> : vector<16xf32>
    %124 = vector.multi_reduction <add>, %123, %cst_21 [1] : vector<16x32xf32> to vector<16xf32>
    %125 = vector.shape_cast %124 : vector<16xf32> to vector<16x1xf32>
    %cst_22 = arith.constant 3.200000e+01 : f32
    %126 = vector.broadcast %cst_22 : f32 to vector<16x1xf32>
    %127 = arith.divf %125, %126 : vector<16x1xf32>
    %128 = vector.broadcast %127 : vector<16x1xf32> to vector<16x32xf32>
    %129 = arith.subf %123, %128 : vector<16x32xf32>
    %130 = arith.mulf %129, %129 : vector<16x32xf32>
    %cst_23 = arith.constant dense<0.000000e+00> : vector<16xf32>
    %131 = vector.multi_reduction <add>, %130, %cst_23 [1] : vector<16x32xf32> to vector<16xf32>
    %132 = vector.shape_cast %131 : vector<16xf32> to vector<16x1xf32>
    %cst_24 = arith.constant 3.200000e+01 : f32
    %133 = vector.broadcast %cst_24 : f32 to vector<16x1xf32>
    %134 = arith.divf %132, %133 : vector<16x1xf32>
    %135 = vector.broadcast %127 : vector<16x1xf32> to vector<16x32xf32>
    %136 = arith.subf %123, %135 : vector<16x32xf32>
    %cst_25 = arith.constant 9.99999974E-6 : f32
    %137 = vector.broadcast %cst_25 : f32 to vector<16x1xf32>
    %138 = arith.addf %134, %137 : vector<16x1xf32>
    %139 = math.rsqrt %138 : vector<16x1xf32>
    %140 = vector.broadcast %139 : vector<16x1xf32> to vector<16x32xf32>
    %141 = arith.mulf %136, %140 : vector<16x32xf32>
    %142 = vector.broadcast %7 : vector<1x32xf32> to vector<16x32xf32>
    %143 = arith.mulf %141, %142 : vector<16x32xf32>
    %144 = vector.broadcast %8 : vector<1x32xf32> to vector<16x32xf32>
    %145 = arith.addf %143, %144 : vector<16x32xf32>
    %c0_26 = arith.constant 0 : index
    %c0_27 = arith.constant 0 : index
    %c0_28 = arith.constant 0 : index
    %146 = vector.load %arg4[%c0_26, %c0_27, %c0_28] : memref<1x32x64xf32, #tpu.memory_space<vmem>>, vector<1x32x64xf32>
    %147 = vector.shape_cast %146 : vector<1x32x64xf32> to vector<32x64xf32>
    %cst_29 = arith.constant dense<0.000000e+00> : vector<16x64xf32>
    %148 = tpu.matmul %145, %147, %cst_29 {dimension_numbers = #tpu.dot_dimension_numbers<[1], [0], [0], [1], [0, 0, 1, 1], [], []>} : vector<16x32xf32>, vector<32x64xf32>, vector<16x64xf32> -> vector<16x64xf32>
    %149 = vector.broadcast %9 : vector<1x64xf32> to vector<16x64xf32>
    %150 = arith.addf %148, %149 : vector<16x64xf32>
    %cst_30 = arith.constant 0.000000e+00 : f32
    %151 = vector.broadcast %cst_30 : f32 to vector<16x64xf32>
    %152 = arith.maximumf %150, %151 : vector<16x64xf32>
    %c0_31 = arith.constant 0 : index
    %c0_32 = arith.constant 0 : index
    %c0_33 = arith.constant 0 : index
    %153 = vector.load %arg5[%c0_31, %c0_32, %c0_33] : memref<1x64x32xf32, #tpu.memory_space<vmem>>, vector<1x64x32xf32>
    %154 = vector.shape_cast %153 : vector<1x64x32xf32> to vector<64x32xf32>
    %cst_34 = arith.constant dense<0.000000e+00> : vector<16x32xf32>
    %155 = tpu.matmul %152, %154, %cst_34 {dimension_numbers = #tpu.dot_dimension_numbers<[1], [0], [0], [1], [0, 0, 1, 1], [], []>} : vector<16x64xf32>, vector<64x32xf32>, vector<16x32xf32> -> vector<16x32xf32>
    %156 = vector.broadcast %10 : vector<1x32xf32> to vector<16x32xf32>
    %157 = arith.addf %155, %156 : vector<16x32xf32>
    %158 = arith.addf %145, %157 : vector<16x32xf32>
    %cst_35 = arith.constant dense<0.000000e+00> : vector<16xf32>
    %159 = vector.multi_reduction <add>, %158, %cst_35 [1] : vector<16x32xf32> to vector<16xf32>
    %160 = vector.shape_cast %159 : vector<16xf32> to vector<16x1xf32>
    %cst_36 = arith.constant 3.200000e+01 : f32
    %161 = vector.broadcast %cst_36 : f32 to vector<16x1xf32>
    %162 = arith.divf %160, %161 : vector<16x1xf32>
    %163 = vector.broadcast %162 : vector<16x1xf32> to vector<16x32xf32>
    %164 = arith.subf %158, %163 : vector<16x32xf32>
    %165 = arith.mulf %164, %164 : vector<16x32xf32>
    %cst_37 = arith.constant dense<0.000000e+00> : vector<16xf32>
    %166 = vector.multi_reduction <add>, %165, %cst_37 [1] : vector<16x32xf32> to vector<16xf32>
    %167 = vector.shape_cast %166 : vector<16xf32> to vector<16x1xf32>
    %cst_38 = arith.constant 3.200000e+01 : f32
    %168 = vector.broadcast %cst_38 : f32 to vector<16x1xf32>
    %169 = arith.divf %167, %168 : vector<16x1xf32>
    %170 = vector.broadcast %162 : vector<16x1xf32> to vector<16x32xf32>
    %171 = arith.subf %158, %170 : vector<16x32xf32>
    %cst_39 = arith.constant 9.99999974E-6 : f32
    %172 = vector.broadcast %cst_39 : f32 to vector<16x1xf32>
    %173 = arith.addf %169, %172 : vector<16x1xf32>
    %174 = math.rsqrt %173 : vector<16x1xf32>
    %175 = vector.broadcast %174 : vector<16x1xf32> to vector<16x32xf32>
    %176 = arith.mulf %171, %175 : vector<16x32xf32>
    %177 = vector.broadcast %11 : vector<1x32xf32> to vector<16x32xf32>
    %178 = arith.mulf %176, %177 : vector<16x32xf32>
    %179 = vector.broadcast %12 : vector<1x32xf32> to vector<16x32xf32>
    %180 = arith.addf %178, %179 : vector<16x32xf32>
    %181 = vector.shape_cast %180 : vector<16x32xf32> to vector<2x8x32xf32>
    %c0_40 = arith.constant 0 : index
    %c0_41 = arith.constant 0 : index
    %c0_42 = arith.constant 0 : index
    %182 = vector.load %arg9[%c0_40, %c0_41, %c0_42] : memref<2x8x32xf32, #tpu.memory_space<vmem>>, vector<2x8x32xf32>
    tpu.vector_store %arg9[%c0_40, %c0_41, %c0_42], %181 {strides = array<i32>} : memref<2x8x32xf32, #tpu.memory_space<vmem>>, vector<2x8x32xf32>,
    %c1_i32 = arith.constant 1 : i32
    %183 = arith.cmpi eq, %arg0, %c1_i32 : i32
    %184 = arith.extui %183 : i1 to i32
    %c0_i32_43 = arith.constant 0 : i32
    %185 = arith.cmpi ne, %184, %c0_i32_43 : i32
    scf.if %185 {
      %cst_44 = arith.constant dense<0.000000e+00> : vector<2x32xf32>
      %186 = vector.multi_reduction <add>, %181, %cst_44 [1] : vector<2x8x32xf32> to vector<2x32xf32>
      %cst_45 = arith.constant 8.000000e+00 : f32
      %187 = vector.broadcast %cst_45 : f32 to vector<2x32xf32>
      %188 = arith.divf %186, %187 : vector<2x32xf32>
      %c0_46 = arith.constant 0 : index
      %c0_47 = arith.constant 0 : index
      %189 = vector.load %arg7[%c0_46, %c0_47] : memref<32x128xf32, #tpu.memory_space<vmem>>, vector<32x128xf32>
      %cst_48 = arith.constant dense<0.000000e+00> : vector<2x128xf32>
      %190 = tpu.matmul %188, %189, %cst_48 {dimension_numbers = #tpu.dot_dimension_numbers<[1], [0], [0], [1], [0, 0, 1, 1], [], []>} : vector<2x32xf32>, vector<32x128xf32>, vector<2x128xf32> -> vector<2x128xf32>
      %c0_49 = arith.constant 0 : index
      %c0_50 = arith.constant 0 : index
      %191 = vector.load %arg8[%c0_49, %c0_50] : memref<1x128xf32, #tpu.memory_space<vmem>>, vector<1x128xf32>
      %192 = vector.broadcast %191 : vector<1x128xf32> to vector<2x128xf32>
      %193 = arith.addf %190, %192 : vector<2x128xf32>
      %c0_51 = arith.constant 0 : index
      %c0_52 = arith.constant 0 : index
      %194 = vector.load %arg10[%c0_51, %c0_52] : memref<2x128xf32, #tpu.memory_space<vmem>>, vector<2x128xf32>
      tpu.vector_store %arg10[%c0_51, %c0_52], %193 {strides = array<i32>} : memref<2x128xf32, #tpu.memory_space<vmem>>, vector<2x128xf32>,
    } else {
    }
    return
  }
  func.func @transform_0(%arg0: i32) -> (i32, i32, i32) {
    %c0_i32 = arith.constant 0 : i32
    %c0_i32_0 = arith.constant 0 : i32
    %c0_i32_1 = arith.constant 0 : i32
    %c0_i32_2 = arith.constant 0 : i32
    return %c0_i32, %c0_i32_0, %c0_i32_1 : i32, i32, i32
  }
  func.func @transform_1(%arg0: i32) -> (i32, i32, i32) {
    %c0_i32 = arith.constant 0 : i32
    %c0_i32_0 = arith.constant 0 : i32
    %c0_i32_1 = arith.constant 0 : i32
    return %arg0, %c0_i32, %c0_i32_0 : i32, i32, i32
  }
  func.func @transform_2(%arg0: i32) -> (i32, i32, i32) {
    %c0_i32 = arith.constant 0 : i32
    %c0_i32_0 = arith.constant 0 : i32
    %c0_i32_1 = arith.constant 0 : i32
    return %arg0, %c0_i32, %c0_i32_0 : i32, i32, i32
  }
  func.func @transform_3(%arg0: i32) -> (i32, i32, i32) {
    %c0_i32 = arith.constant 0 : i32
    %c0_i32_0 = arith.constant 0 : i32
    %c0_i32_1 = arith.constant 0 : i32
    return %arg0, %c0_i32, %c0_i32_0 : i32, i32, i32
  }
  func.func @transform_4(%arg0: i32) -> (i32, i32, i32) {
    %c0_i32 = arith.constant 0 : i32
    %c0_i32_0 = arith.constant 0 : i32
    %c0_i32_1 = arith.constant 0 : i32
    return %arg0, %c0_i32, %c0_i32_0 : i32, i32, i32
  }
  func.func @transform_5(%arg0: i32) -> (i32, i32, i32) {
    %c0_i32 = arith.constant 0 : i32
    %c0_i32_0 = arith.constant 0 : i32
    %c0_i32_1 = arith.constant 0 : i32
    return %arg0, %c0_i32, %c0_i32_0 : i32, i32, i32
  }
  func.func @transform_6(%arg0: i32) -> (i32, i32) {
    %c0_i32 = arith.constant 0 : i32
    %c0_i32_0 = arith.constant 0 : i32
    %c0_i32_1 = arith.constant 0 : i32
    return %c0_i32, %c0_i32_0 : i32, i32
  }
  func.func @transform_7(%arg0: i32) -> (i32, i32) {
    %c0_i32 = arith.constant 0 : i32
    %c0_i32_0 = arith.constant 0 : i32
    %c0_i32_1 = arith.constant 0 : i32
    return %c0_i32, %c0_i32_0 : i32, i32
  }
  func.func @transform_8(%arg0: i32) -> (i32, i32, i32) {
    %c0_i32 = arith.constant 0 : i32
    %c0_i32_0 = arith.constant 0 : i32
    %c0_i32_1 = arith.constant 0 : i32
    %c0_i32_2 = arith.constant 0 : i32
    return %c0_i32, %c0_i32_0, %c0_i32_1 : i32, i32, i32
  }
  func.func @transform_9(%arg0: i32) -> (i32, i32) {
    %c0_i32 = arith.constant 0 : i32
    %c0_i32_0 = arith.constant 0 : i32
    %c0_i32_1 = arith.constant 0 : i32
    return %c0_i32, %c0_i32_0 : i32, i32
  }
}

module attributes {stable_mosaic.version = 11 : i64} {
  func.func @_decoder_kernel(%arg0: i32, %arg1: memref<2x16xf32, #tpu.memory_space<vmem>>, %arg2: memref<2x8x32xf32, #tpu.memory_space<vmem>>, %arg3: memref<16x32xf32, #tpu.memory_space<vmem>>, %arg4: memref<1x32xf32, #tpu.memory_space<vmem>>, %arg5: memref<1x32x192xf32, #tpu.memory_space<vmem>>, %arg6: memref<1x32x64xf32, #tpu.memory_space<vmem>>, %arg7: memref<1x64x32xf32, #tpu.memory_space<vmem>>, %arg8: memref<1x13x64xf32, #tpu.memory_space<vmem>>, %arg9: memref<32x128xf32, #tpu.memory_space<vmem>>, %arg10: memref<1x128xf32, #tpu.memory_space<vmem>>, %arg11: memref<2x128xf32, #tpu.memory_space<vmem>>, %arg12: memref<2x32xf32, #tpu.memory_space<vmem>>, %arg13: memref<2x32xf32, #tpu.memory_space<vmem>>) attributes {dimension_semantics = [#tpu.dimension_semantics<arbitrary>], iteration_bounds = array<i64: 2>, scalar_prefetch = 0 : i64, scratch_operands = 2 : i64, tpu.core_type = #tpu.core_type<tc>, window_params = [{pipeline_mode = #tpu.pipeline_mode<synchronous>, transform_indices = @transform_0, window_bounds = array<i64: 2, 16>}, {pipeline_mode = #tpu.pipeline_mode<synchronous>, transform_indices = @transform_1, window_bounds = array<i64: 2, 8, 32>}, {pipeline_mode = #tpu.pipeline_mode<synchronous>, transform_indices = @transform_2, window_bounds = array<i64: 16, 32>}, {pipeline_mode = #tpu.pipeline_mode<synchronous>, transform_indices = @transform_3, window_bounds = array<i64: 1, 32>}, {transform_indices = @transform_4, window_bounds = array<i64: 1, 32, 192>}, {transform_indices = @transform_5, window_bounds = array<i64: 1, 32, 64>}, {transform_indices = @transform_6, window_bounds = array<i64: 1, 64, 32>}, {transform_indices = @transform_7, window_bounds = array<i64: 1, 13, 64>}, {pipeline_mode = #tpu.pipeline_mode<synchronous>, transform_indices = @transform_8, window_bounds = array<i64: 32, 128>}, {pipeline_mode = #tpu.pipeline_mode<synchronous>, transform_indices = @transform_9, window_bounds = array<i64: 1, 128>}, {pipeline_mode = #tpu.pipeline_mode<synchronous>, transform_indices = @transform_10, window_bounds = array<i64: 2, 128>}]} {
    %c0_i32 = arith.constant 0 : i32
    %0 = arith.cmpi eq, %arg0, %c0_i32 : i32
    %1 = arith.extui %0 : i1 to i32
    %c0_i32_0 = arith.constant 0 : i32
    %2 = arith.cmpi ne, %1, %c0_i32_0 : i32
    scf.if %2 {
      %c0_57 = arith.constant 0 : index
      %c0_58 = arith.constant 0 : index
      %195 = vector.load %arg1[%c0_57, %c0_58] : memref<2x16xf32, #tpu.memory_space<vmem>>, vector<2x16xf32>
      %c0_59 = arith.constant 0 : index
      %c0_60 = arith.constant 0 : index
      %196 = vector.load %arg3[%c0_59, %c0_60] : memref<16x32xf32, #tpu.memory_space<vmem>>, vector<16x32xf32>
      %cst_61 = arith.constant dense<0.000000e+00> : vector<2x32xf32>
      %197 = tpu.matmul %195, %196, %cst_61 {dimension_numbers = #tpu.dot_dimension_numbers<[1], [0], [0], [1], [0, 0, 1, 1], [], []>} : vector<2x16xf32>, vector<16x32xf32>, vector<2x32xf32> -> vector<2x32xf32>
      %c0_62 = arith.constant 0 : index
      %c0_63 = arith.constant 0 : index
      %198 = vector.load %arg4[%c0_62, %c0_63] : memref<1x32xf32, #tpu.memory_space<vmem>>, vector<1x32xf32>
      %199 = vector.broadcast %198 : vector<1x32xf32> to vector<2x32xf32>
      %200 = arith.addf %197, %199 : vector<2x32xf32>
      %c0_64 = arith.constant 0 : index
      %c0_65 = arith.constant 0 : index
      %201 = vector.load %arg12[%c0_64, %c0_65] : memref<2x32xf32, #tpu.memory_space<vmem>>, vector<2x32xf32>
      tpu.vector_store %arg12[%c0_64, %c0_65], %200 {strides = array<i32>} : memref<2x32xf32, #tpu.memory_space<vmem>>, vector<2x32xf32>,
    } else {
    }
    %c0 = arith.constant 0 : index
    %c0_1 = arith.constant 0 : index
    %c0_2 = arith.constant 0 : index
    %3 = vector.load %arg5[%c0, %c0_1, %c0_2] : memref<1x32x192xf32, #tpu.memory_space<vmem>>, vector<1x32x192xf32>
    %4 = vector.shape_cast %3 : vector<1x32x192xf32> to vector<32x192xf32>
    %5 = vector.extract_strided_slice %4 {offsets = [0, 0], sizes = [32, 32], strides = [1, 1]} : vector<32x192xf32> to vector<32x32xf32>
    %6 = vector.extract_strided_slice %4 {offsets = [0, 32], sizes = [32, 32], strides = [1, 1]} : vector<32x192xf32> to vector<32x32xf32>
    %7 = vector.extract_strided_slice %4 {offsets = [0, 64], sizes = [32, 32], strides = [1, 1]} : vector<32x192xf32> to vector<32x32xf32>
    %8 = vector.extract_strided_slice %4 {offsets = [0, 96], sizes = [32, 64], strides = [1, 1]} : vector<32x192xf32> to vector<32x64xf32>
    %9 = vector.extract_strided_slice %4 {offsets = [0, 160], sizes = [32, 32], strides = [1, 1]} : vector<32x192xf32> to vector<32x32xf32>
    %c0_3 = arith.constant 0 : index
    %c0_4 = arith.constant 0 : index
    %c0_5 = arith.constant 0 : index
    %10 = vector.load %arg8[%c0_3, %c0_4, %c0_5] : memref<1x13x64xf32, #tpu.memory_space<vmem>>, vector<1x13x64xf32>
    %11 = vector.shape_cast %10 : vector<1x13x64xf32> to vector<13x64xf32>
    %12 = vector.extract_strided_slice %11 {offsets = [0, 0], sizes = [1, 32], strides = [1, 1]} : vector<13x64xf32> to vector<1x32xf32>
    %13 = vector.extract_strided_slice %11 {offsets = [1, 0], sizes = [1, 32], strides = [1, 1]} : vector<13x64xf32> to vector<1x32xf32>
    %14 = vector.extract_strided_slice %11 {offsets = [2, 0], sizes = [1, 32], strides = [1, 1]} : vector<13x64xf32> to vector<1x32xf32>
    %15 = vector.extract_strided_slice %11 {offsets = [3, 0], sizes = [1, 32], strides = [1, 1]} : vector<13x64xf32> to vector<1x32xf32>
    %16 = vector.extract_strided_slice %11 {offsets = [4, 0], sizes = [1, 32], strides = [1, 1]} : vector<13x64xf32> to vector<1x32xf32>
    %17 = vector.extract_strided_slice %11 {offsets = [5, 0], sizes = [1, 64], strides = [1, 1]} : vector<13x64xf32> to vector<1x64xf32>
    %18 = vector.extract_strided_slice %11 {offsets = [6, 0], sizes = [1, 32], strides = [1, 1]} : vector<13x64xf32> to vector<1x32xf32>
    %19 = vector.extract_strided_slice %11 {offsets = [7, 0], sizes = [1, 32], strides = [1, 1]} : vector<13x64xf32> to vector<1x32xf32>
    %20 = vector.extract_strided_slice %11 {offsets = [8, 0], sizes = [1, 32], strides = [1, 1]} : vector<13x64xf32> to vector<1x32xf32>
    %21 = vector.extract_strided_slice %11 {offsets = [9, 0], sizes = [1, 64], strides = [1, 1]} : vector<13x64xf32> to vector<1x64xf32>
    %22 = vector.extract_strided_slice %11 {offsets = [10, 0], sizes = [1, 32], strides = [1, 1]} : vector<13x64xf32> to vector<1x32xf32>
    %23 = vector.extract_strided_slice %11 {offsets = [11, 0], sizes = [1, 32], strides = [1, 1]} : vector<13x64xf32> to vector<1x32xf32>
    %24 = vector.extract_strided_slice %11 {offsets = [12, 0], sizes = [1, 32], strides = [1, 1]} : vector<13x64xf32> to vector<1x32xf32>
    %c0_6 = arith.constant 0 : index
    %c0_7 = arith.constant 0 : index
    %25 = vector.load %arg12[%c0_6, %c0_7] : memref<2x32xf32, #tpu.memory_space<vmem>>, vector<2x32xf32>
    %cst = arith.constant dense<0.000000e+00> : vector<2x32xf32>
    %26 = tpu.matmul %25, %5, %cst {dimension_numbers = #tpu.dot_dimension_numbers<[1], [0], [0], [1], [0, 0, 1, 1], [], []>} : vector<2x32xf32>, vector<32x32xf32>, vector<2x32xf32> -> vector<2x32xf32>
    %27 = vector.broadcast %12 : vector<1x32xf32> to vector<2x32xf32>
    %28 = arith.addf %26, %27 : vector<2x32xf32>
    %cst_8 = arith.constant dense<0.000000e+00> : vector<2x32xf32>
    %29 = tpu.matmul %28, %6, %cst_8 {dimension_numbers = #tpu.dot_dimension_numbers<[1], [0], [0], [1], [0, 0, 1, 1], [], []>} : vector<2x32xf32>, vector<32x32xf32>, vector<2x32xf32> -> vector<2x32xf32>
    %30 = arith.addf %25, %29 : vector<2x32xf32>
    %31 = vector.broadcast %13 : vector<1x32xf32> to vector<2x32xf32>
    %32 = arith.addf %30, %31 : vector<2x32xf32>
    %cst_9 = arith.constant dense<0.000000e+00> : vector<2xf32>
    %33 = vector.multi_reduction <add>, %32, %cst_9 [1] : vector<2x32xf32> to vector<2xf32>
    %34 = vector.shape_cast %33 : vector<2xf32> to vector<2x1xf32>
    %cst_10 = arith.constant 3.200000e+01 : f32
    %35 = vector.broadcast %cst_10 : f32 to vector<2x1xf32>
    %36 = arith.divf %34, %35 : vector<2x1xf32>
    %37 = vector.broadcast %36 : vector<2x1xf32> to vector<2x32xf32>
    %38 = arith.subf %32, %37 : vector<2x32xf32>
    %39 = arith.mulf %38, %38 : vector<2x32xf32>
    %cst_11 = arith.constant dense<0.000000e+00> : vector<2xf32>
    %40 = vector.multi_reduction <add>, %39, %cst_11 [1] : vector<2x32xf32> to vector<2xf32>
    %41 = vector.shape_cast %40 : vector<2xf32> to vector<2x1xf32>
    %cst_12 = arith.constant 3.200000e+01 : f32
    %42 = vector.broadcast %cst_12 : f32 to vector<2x1xf32>
    %43 = arith.divf %41, %42 : vector<2x1xf32>
    %44 = vector.broadcast %36 : vector<2x1xf32> to vector<2x32xf32>
    %45 = arith.subf %32, %44 : vector<2x32xf32>
    %cst_13 = arith.constant 9.99999974E-6 : f32
    %46 = vector.broadcast %cst_13 : f32 to vector<2x1xf32>
    %47 = arith.addf %43, %46 : vector<2x1xf32>
    %48 = math.rsqrt %47 : vector<2x1xf32>
    %49 = vector.broadcast %48 : vector<2x1xf32> to vector<2x32xf32>
    %50 = arith.mulf %45, %49 : vector<2x32xf32>
    %51 = vector.broadcast %14 : vector<1x32xf32> to vector<2x32xf32>
    %52 = arith.mulf %50, %51 : vector<2x32xf32>
    %53 = vector.broadcast %15 : vector<1x32xf32> to vector<2x32xf32>
    %54 = arith.addf %52, %53 : vector<2x32xf32>
    %c0_14 = arith.constant 0 : index
    %c0_15 = arith.constant 0 : index
    %c0_16 = arith.constant 0 : index
    %55 = vector.load %arg2[%c0_14, %c0_15, %c0_16] : memref<2x8x32xf32, #tpu.memory_space<vmem>>, vector<2x8x32xf32>
    %56 = vector.shape_cast %55 : vector<2x8x32xf32> to vector<16x32xf32>
    %cst_17 = arith.constant dense<0.000000e+00> : vector<16x64xf32>
    %57 = tpu.matmul %56, %8, %cst_17 {dimension_numbers = #tpu.dot_dimension_numbers<[1], [0], [0], [1], [0, 0, 1, 1], [], []>} : vector<16x32xf32>, vector<32x64xf32>, vector<16x64xf32> -> vector<16x64xf32>
    %58 = vector.broadcast %17 : vector<1x64xf32> to vector<16x64xf32>
    %59 = arith.addf %57, %58 : vector<16x64xf32>
    %cst_18 = arith.constant dense<0.000000e+00> : vector<2x32xf32>
    %60 = tpu.matmul %54, %7, %cst_18 {dimension_numbers = #tpu.dot_dimension_numbers<[1], [0], [0], [1], [0, 0, 1, 1], [], []>} : vector<2x32xf32>, vector<32x32xf32>, vector<2x32xf32> -> vector<2x32xf32>
    %61 = vector.broadcast %16 : vector<1x32xf32> to vector<2x32xf32>
    %62 = arith.addf %60, %61 : vector<2x32xf32>
    %63 = vector.extract_strided_slice %59 {offsets = [0, 0], sizes = [8, 32], strides = [1, 1]} : vector<16x64xf32> to vector<8x32xf32>
    %64 = vector.extract_strided_slice %59 {offsets = [0, 32], sizes = [8, 32], strides = [1, 1]} : vector<16x64xf32> to vector<8x32xf32>
    %65 = vector.extract_strided_slice %62 {offsets = [0, 0], sizes = [1, 32], strides = [1, 1]} : vector<2x32xf32> to vector<1x32xf32>
    %66 = vector.broadcast %65 : vector<1x32xf32> to vector<8x32xf32>
    %67 = arith.mulf %63, %66 : vector<8x32xf32>
    %68 = vector.extract_strided_slice %67 {offsets = [0, 0], sizes = [8, 16], strides = [1, 1]} : vector<8x32xf32> to vector<8x16xf32>
    %cst_19 = arith.constant dense<0.000000e+00> : vector<8xf32>
    %69 = vector.multi_reduction <add>, %68, %cst_19 [1] : vector<8x16xf32> to vector<8xf32>
    %70 = vector.shape_cast %69 : vector<8xf32> to vector<8x1xf32>
    %71 = vector.extract_strided_slice %67 {offsets = [0, 16], sizes = [8, 16], strides = [1, 1]} : vector<8x32xf32> to vector<8x16xf32>
    %cst_20 = arith.constant dense<0.000000e+00> : vector<8xf32>
    %72 = vector.multi_reduction <add>, %71, %cst_20 [1] : vector<8x16xf32> to vector<8xf32>
    %73 = vector.shape_cast %72 : vector<8xf32> to vector<8x1xf32>
    %74 = tpu.concatenate %70, %73 in 1 : vector<8x1xf32>, vector<8x1xf32> -> vector<8x2xf32>
    %cst_21 = arith.constant dense<0xFF800000> : vector<2xf32>
    %75 = vector.multi_reduction <maximumf>, %74, %cst_21 [0] : vector<8x2xf32> to vector<2xf32>
    %76 = vector.shape_cast %75 : vector<2xf32> to vector<1x2xf32>
    %77 = vector.broadcast %76 : vector<1x2xf32> to vector<8x2xf32>
    %78 = arith.subf %74, %77 : vector<8x2xf32>
    %79 = math.exp %78 : vector<8x2xf32>
    %cst_22 = arith.constant dense<0.000000e+00> : vector<2xf32>
    %80 = vector.multi_reduction <add>, %79, %cst_22 [0] : vector<8x2xf32> to vector<2xf32>
    %81 = vector.shape_cast %80 : vector<2xf32> to vector<1x2xf32>
    %82 = tpu.reciprocal %81 {approx = true} : vector<1x2xf32> -> vector<1x2xf32>
    %83 = vector.broadcast %82 : vector<1x2xf32> to vector<8x2xf32>
    %84 = arith.mulf %79, %83 : vector<8x2xf32>
    %85 = vector.extract_strided_slice %84 {offsets = [0, 0], sizes = [8, 1], strides = [1, 1]} : vector<8x2xf32> to vector<8x1xf32>
    %86 = vector.shape_cast %85 : vector<8x1xf32> to vector<8x1xf32>
    %87 = vector.broadcast %86 : vector<8x1xf32> to vector<8x16xf32>
    %88 = vector.extract_strided_slice %84 {offsets = [0, 1], sizes = [8, 1], strides = [1, 1]} : vector<8x2xf32> to vector<8x1xf32>
    %89 = vector.shape_cast %88 : vector<8x1xf32> to vector<8x1xf32>
    %90 = vector.broadcast %89 : vector<8x1xf32> to vector<8x16xf32>
    %91 = tpu.concatenate %87, %90 in 1 : vector<8x16xf32>, vector<8x16xf32> -> vector<8x32xf32>
    %92 = arith.mulf %91, %64 : vector<8x32xf32>
    %cst_23 = arith.constant dense<0.000000e+00> : vector<32xf32>
    %93 = vector.multi_reduction <add>, %92, %cst_23 [0] : vector<8x32xf32> to vector<32xf32>
    %94 = vector.shape_cast %93 : vector<32xf32> to vector<1x32xf32>
    %c0_24 = arith.constant 0 : index
    %c0_25 = arith.constant 0 : index
    %95 = vector.load %arg13[%c0_24, %c0_25] : memref<2x32xf32, #tpu.memory_space<vmem>>, vector<1x32xf32>
    tpu.vector_store %arg13[%c0_24, %c0_25], %94 {strides = array<i32>} : memref<2x32xf32, #tpu.memory_space<vmem>>, vector<1x32xf32>,
    %96 = vector.extract_strided_slice %59 {offsets = [8, 0], sizes = [8, 32], strides = [1, 1]} : vector<16x64xf32> to vector<8x32xf32>
    %97 = vector.extract_strided_slice %59 {offsets = [8, 32], sizes = [8, 32], strides = [1, 1]} : vector<16x64xf32> to vector<8x32xf32>
    %98 = vector.extract_strided_slice %62 {offsets = [1, 0], sizes = [1, 32], strides = [1, 1]} : vector<2x32xf32> to vector<1x32xf32>
    %99 = vector.broadcast %98 : vector<1x32xf32> to vector<8x32xf32>
    %100 = arith.mulf %96, %99 : vector<8x32xf32>
    %101 = vector.extract_strided_slice %100 {offsets = [0, 0], sizes = [8, 16], strides = [1, 1]} : vector<8x32xf32> to vector<8x16xf32>
    %cst_26 = arith.constant dense<0.000000e+00> : vector<8xf32>
    %102 = vector.multi_reduction <add>, %101, %cst_26 [1] : vector<8x16xf32> to vector<8xf32>
    %103 = vector.shape_cast %102 : vector<8xf32> to vector<8x1xf32>
    %104 = vector.extract_strided_slice %100 {offsets = [0, 16], sizes = [8, 16], strides = [1, 1]} : vector<8x32xf32> to vector<8x16xf32>
    %cst_27 = arith.constant dense<0.000000e+00> : vector<8xf32>
    %105 = vector.multi_reduction <add>, %104, %cst_27 [1] : vector<8x16xf32> to vector<8xf32>
    %106 = vector.shape_cast %105 : vector<8xf32> to vector<8x1xf32>
    %107 = tpu.concatenate %103, %106 in 1 : vector<8x1xf32>, vector<8x1xf32> -> vector<8x2xf32>
    %cst_28 = arith.constant dense<0xFF800000> : vector<2xf32>
    %108 = vector.multi_reduction <maximumf>, %107, %cst_28 [0] : vector<8x2xf32> to vector<2xf32>
    %109 = vector.shape_cast %108 : vector<2xf32> to vector<1x2xf32>
    %110 = vector.broadcast %109 : vector<1x2xf32> to vector<8x2xf32>
    %111 = arith.subf %107, %110 : vector<8x2xf32>
    %112 = math.exp %111 : vector<8x2xf32>
    %cst_29 = arith.constant dense<0.000000e+00> : vector<2xf32>
    %113 = vector.multi_reduction <add>, %112, %cst_29 [0] : vector<8x2xf32> to vector<2xf32>
    %114 = vector.shape_cast %113 : vector<2xf32> to vector<1x2xf32>
    %115 = tpu.reciprocal %114 {approx = true} : vector<1x2xf32> -> vector<1x2xf32>
    %116 = vector.broadcast %115 : vector<1x2xf32> to vector<8x2xf32>
    %117 = arith.mulf %112, %116 : vector<8x2xf32>
    %118 = vector.extract_strided_slice %117 {offsets = [0, 0], sizes = [8, 1], strides = [1, 1]} : vector<8x2xf32> to vector<8x1xf32>
    %119 = vector.shape_cast %118 : vector<8x1xf32> to vector<8x1xf32>
    %120 = vector.broadcast %119 : vector<8x1xf32> to vector<8x16xf32>
    %121 = vector.extract_strided_slice %117 {offsets = [0, 1], sizes = [8, 1], strides = [1, 1]} : vector<8x2xf32> to vector<8x1xf32>
    %122 = vector.shape_cast %121 : vector<8x1xf32> to vector<8x1xf32>
    %123 = vector.broadcast %122 : vector<8x1xf32> to vector<8x16xf32>
    %124 = tpu.concatenate %120, %123 in 1 : vector<8x16xf32>, vector<8x16xf32> -> vector<8x32xf32>
    %125 = arith.mulf %124, %97 : vector<8x32xf32>
    %cst_30 = arith.constant dense<0.000000e+00> : vector<32xf32>
    %126 = vector.multi_reduction <add>, %125, %cst_30 [0] : vector<8x32xf32> to vector<32xf32>
    %127 = vector.shape_cast %126 : vector<32xf32> to vector<1x32xf32>
    %c1 = arith.constant 1 : index
    %c0_31 = arith.constant 0 : index
    %128 = vector.load %arg13[%c1, %c0_31] : memref<2x32xf32, #tpu.memory_space<vmem>>, vector<1x32xf32>
    tpu.vector_store %arg13[%c1, %c0_31], %127 {strides = array<i32>} : memref<2x32xf32, #tpu.memory_space<vmem>>, vector<1x32xf32>,
    %c0_32 = arith.constant 0 : index
    %c0_33 = arith.constant 0 : index
    %129 = vector.load %arg13[%c0_32, %c0_33] : memref<2x32xf32, #tpu.memory_space<vmem>>, vector<2x32xf32>
    %cst_34 = arith.constant dense<0.000000e+00> : vector<2x32xf32>
    %130 = tpu.matmul %129, %9, %cst_34 {dimension_numbers = #tpu.dot_dimension_numbers<[1], [0], [0], [1], [0, 0, 1, 1], [], []>} : vector<2x32xf32>, vector<32x32xf32>, vector<2x32xf32> -> vector<2x32xf32>
    %131 = arith.addf %54, %130 : vector<2x32xf32>
    %132 = vector.broadcast %18 : vector<1x32xf32> to vector<2x32xf32>
    %133 = arith.addf %131, %132 : vector<2x32xf32>
    %cst_35 = arith.constant dense<0.000000e+00> : vector<2xf32>
    %134 = vector.multi_reduction <add>, %133, %cst_35 [1] : vector<2x32xf32> to vector<2xf32>
    %135 = vector.shape_cast %134 : vector<2xf32> to vector<2x1xf32>
    %cst_36 = arith.constant 3.200000e+01 : f32
    %136 = vector.broadcast %cst_36 : f32 to vector<2x1xf32>
    %137 = arith.divf %135, %136 : vector<2x1xf32>
    %138 = vector.broadcast %137 : vector<2x1xf32> to vector<2x32xf32>
    %139 = arith.subf %133, %138 : vector<2x32xf32>
    %140 = arith.mulf %139, %139 : vector<2x32xf32>
    %cst_37 = arith.constant dense<0.000000e+00> : vector<2xf32>
    %141 = vector.multi_reduction <add>, %140, %cst_37 [1] : vector<2x32xf32> to vector<2xf32>
    %142 = vector.shape_cast %141 : vector<2xf32> to vector<2x1xf32>
    %cst_38 = arith.constant 3.200000e+01 : f32
    %143 = vector.broadcast %cst_38 : f32 to vector<2x1xf32>
    %144 = arith.divf %142, %143 : vector<2x1xf32>
    %145 = vector.broadcast %137 : vector<2x1xf32> to vector<2x32xf32>
    %146 = arith.subf %133, %145 : vector<2x32xf32>
    %cst_39 = arith.constant 9.99999974E-6 : f32
    %147 = vector.broadcast %cst_39 : f32 to vector<2x1xf32>
    %148 = arith.addf %144, %147 : vector<2x1xf32>
    %149 = math.rsqrt %148 : vector<2x1xf32>
    %150 = vector.broadcast %149 : vector<2x1xf32> to vector<2x32xf32>
    %151 = arith.mulf %146, %150 : vector<2x32xf32>
    %152 = vector.broadcast %19 : vector<1x32xf32> to vector<2x32xf32>
    %153 = arith.mulf %151, %152 : vector<2x32xf32>
    %154 = vector.broadcast %20 : vector<1x32xf32> to vector<2x32xf32>
    %155 = arith.addf %153, %154 : vector<2x32xf32>
    %c0_40 = arith.constant 0 : index
    %c0_41 = arith.constant 0 : index
    %c0_42 = arith.constant 0 : index
    %156 = vector.load %arg6[%c0_40, %c0_41, %c0_42] : memref<1x32x64xf32, #tpu.memory_space<vmem>>, vector<1x32x64xf32>
    %157 = vector.shape_cast %156 : vector<1x32x64xf32> to vector<32x64xf32>
    %cst_43 = arith.constant dense<0.000000e+00> : vector<2x64xf32>
    %158 = tpu.matmul %155, %157, %cst_43 {dimension_numbers = #tpu.dot_dimension_numbers<[1], [0], [0], [1], [0, 0, 1, 1], [], []>} : vector<2x32xf32>, vector<32x64xf32>, vector<2x64xf32> -> vector<2x64xf32>
    %159 = vector.broadcast %21 : vector<1x64xf32> to vector<2x64xf32>
    %160 = arith.addf %158, %159 : vector<2x64xf32>
    %cst_44 = arith.constant 0.000000e+00 : f32
    %161 = vector.broadcast %cst_44 : f32 to vector<2x64xf32>
    %162 = arith.maximumf %160, %161 : vector<2x64xf32>
    %c0_45 = arith.constant 0 : index
    %c0_46 = arith.constant 0 : index
    %c0_47 = arith.constant 0 : index
    %163 = vector.load %arg7[%c0_45, %c0_46, %c0_47] : memref<1x64x32xf32, #tpu.memory_space<vmem>>, vector<1x64x32xf32>
    %164 = vector.shape_cast %163 : vector<1x64x32xf32> to vector<64x32xf32>
    %cst_48 = arith.constant dense<0.000000e+00> : vector<2x32xf32>
    %165 = tpu.matmul %162, %164, %cst_48 {dimension_numbers = #tpu.dot_dimension_numbers<[1], [0], [0], [1], [0, 0, 1, 1], [], []>} : vector<2x64xf32>, vector<64x32xf32>, vector<2x32xf32> -> vector<2x32xf32>
    %166 = arith.addf %155, %165 : vector<2x32xf32>
    %167 = vector.broadcast %22 : vector<1x32xf32> to vector<2x32xf32>
    %168 = arith.addf %166, %167 : vector<2x32xf32>
    %cst_49 = arith.constant dense<0.000000e+00> : vector<2xf32>
    %169 = vector.multi_reduction <add>, %168, %cst_49 [1] : vector<2x32xf32> to vector<2xf32>
    %170 = vector.shape_cast %169 : vector<2xf32> to vector<2x1xf32>
    %cst_50 = arith.constant 3.200000e+01 : f32
    %171 = vector.broadcast %cst_50 : f32 to vector<2x1xf32>
    %172 = arith.divf %170, %171 : vector<2x1xf32>
    %173 = vector.broadcast %172 : vector<2x1xf32> to vector<2x32xf32>
    %174 = arith.subf %168, %173 : vector<2x32xf32>
    %175 = arith.mulf %174, %174 : vector<2x32xf32>
    %cst_51 = arith.constant dense<0.000000e+00> : vector<2xf32>
    %176 = vector.multi_reduction <add>, %175, %cst_51 [1] : vector<2x32xf32> to vector<2xf32>
    %177 = vector.shape_cast %176 : vector<2xf32> to vector<2x1xf32>
    %cst_52 = arith.constant 3.200000e+01 : f32
    %178 = vector.broadcast %cst_52 : f32 to vector<2x1xf32>
    %179 = arith.divf %177, %178 : vector<2x1xf32>
    %180 = vector.broadcast %172 : vector<2x1xf32> to vector<2x32xf32>
    %181 = arith.subf %168, %180 : vector<2x32xf32>
    %cst_53 = arith.constant 9.99999974E-6 : f32
    %182 = vector.broadcast %cst_53 : f32 to vector<2x1xf32>
    %183 = arith.addf %179, %182 : vector<2x1xf32>
    %184 = math.rsqrt %183 : vector<2x1xf32>
    %185 = vector.broadcast %184 : vector<2x1xf32> to vector<2x32xf32>
    %186 = arith.mulf %181, %185 : vector<2x32xf32>
    %187 = vector.broadcast %23 : vector<1x32xf32> to vector<2x32xf32>
    %188 = arith.mulf %186, %187 : vector<2x32xf32>
    %189 = vector.broadcast %24 : vector<1x32xf32> to vector<2x32xf32>
    %190 = arith.addf %188, %189 : vector<2x32xf32>
    %c0_54 = arith.constant 0 : index
    %c0_55 = arith.constant 0 : index
    %191 = vector.load %arg12[%c0_54, %c0_55] : memref<2x32xf32, #tpu.memory_space<vmem>>, vector<2x32xf32>
    tpu.vector_store %arg12[%c0_54, %c0_55], %190 {strides = array<i32>} : memref<2x32xf32, #tpu.memory_space<vmem>>, vector<2x32xf32>,
    %c1_i32 = arith.constant 1 : i32
    %192 = arith.cmpi eq, %arg0, %c1_i32 : i32
    %193 = arith.extui %192 : i1 to i32
    %c0_i32_56 = arith.constant 0 : i32
    %194 = arith.cmpi ne, %193, %c0_i32_56 : i32
    scf.if %194 {
      %c0_57 = arith.constant 0 : index
      %c0_58 = arith.constant 0 : index
      %195 = vector.load %arg9[%c0_57, %c0_58] : memref<32x128xf32, #tpu.memory_space<vmem>>, vector<32x128xf32>
      %cst_59 = arith.constant dense<0.000000e+00> : vector<2x128xf32>
      %196 = tpu.matmul %190, %195, %cst_59 {dimension_numbers = #tpu.dot_dimension_numbers<[1], [0], [0], [1], [0, 0, 1, 1], [], []>} : vector<2x32xf32>, vector<32x128xf32>, vector<2x128xf32> -> vector<2x128xf32>
      %c0_60 = arith.constant 0 : index
      %c0_61 = arith.constant 0 : index
      %197 = vector.load %arg10[%c0_60, %c0_61] : memref<1x128xf32, #tpu.memory_space<vmem>>, vector<1x128xf32>
      %198 = vector.broadcast %197 : vector<1x128xf32> to vector<2x128xf32>
      %199 = arith.addf %196, %198 : vector<2x128xf32>
      %c0_62 = arith.constant 0 : index
      %c0_63 = arith.constant 0 : index
      %200 = vector.load %arg11[%c0_62, %c0_63] : memref<2x128xf32, #tpu.memory_space<vmem>>, vector<2x128xf32>
      tpu.vector_store %arg11[%c0_62, %c0_63], %199 {strides = array<i32>} : memref<2x128xf32, #tpu.memory_space<vmem>>, vector<2x128xf32>,
    } else {
    }
    return
  }
  func.func @transform_0(%arg0: i32) -> (i32, i32) {
    %c0_i32 = arith.constant 0 : i32
    %c0_i32_0 = arith.constant 0 : i32
    %c0_i32_1 = arith.constant 0 : i32
    return %c0_i32, %c0_i32_0 : i32, i32
  }
  func.func @transform_1(%arg0: i32) -> (i32, i32, i32) {
    %c0_i32 = arith.constant 0 : i32
    %c0_i32_0 = arith.constant 0 : i32
    %c0_i32_1 = arith.constant 0 : i32
    %c0_i32_2 = arith.constant 0 : i32
    return %c0_i32, %c0_i32_0, %c0_i32_1 : i32, i32, i32
  }
  func.func @transform_2(%arg0: i32) -> (i32, i32) {
    %c0_i32 = arith.constant 0 : i32
    %c0_i32_0 = arith.constant 0 : i32
    %c0_i32_1 = arith.constant 0 : i32
    return %c0_i32, %c0_i32_0 : i32, i32
  }
  func.func @transform_3(%arg0: i32) -> (i32, i32) {
    %c0_i32 = arith.constant 0 : i32
    %c0_i32_0 = arith.constant 0 : i32
    %c0_i32_1 = arith.constant 0 : i32
    return %c0_i32, %c0_i32_0 : i32, i32
  }
  func.func @transform_4(%arg0: i32) -> (i32, i32, i32) {
    %c0_i32 = arith.constant 0 : i32
    %c0_i32_0 = arith.constant 0 : i32
    %c0_i32_1 = arith.constant 0 : i32
    return %arg0, %c0_i32, %c0_i32_0 : i32, i32, i32
  }
  func.func @transform_5(%arg0: i32) -> (i32, i32, i32) {
    %c0_i32 = arith.constant 0 : i32
    %c0_i32_0 = arith.constant 0 : i32
    %c0_i32_1 = arith.constant 0 : i32
    return %arg0, %c0_i32, %c0_i32_0 : i32, i32, i32
  }
  func.func @transform_6(%arg0: i32) -> (i32, i32, i32) {
    %c0_i32 = arith.constant 0 : i32
    %c0_i32_0 = arith.constant 0 : i32
    %c0_i32_1 = arith.constant 0 : i32
    return %arg0, %c0_i32, %c0_i32_0 : i32, i32, i32
  }
  func.func @transform_7(%arg0: i32) -> (i32, i32, i32) {
    %c0_i32 = arith.constant 0 : i32
    %c0_i32_0 = arith.constant 0 : i32
    %c0_i32_1 = arith.constant 0 : i32
    return %arg0, %c0_i32, %c0_i32_0 : i32, i32, i32
  }
  func.func @transform_8(%arg0: i32) -> (i32, i32) {
    %c0_i32 = arith.constant 0 : i32
    %c0_i32_0 = arith.constant 0 : i32
    %c0_i32_1 = arith.constant 0 : i32
    return %c0_i32, %c0_i32_0 : i32, i32
  }
  func.func @transform_9(%arg0: i32) -> (i32, i32) {
    %c0_i32 = arith.constant 0 : i32
    %c0_i32_0 = arith.constant 0 : i32
    %c0_i32_1 = arith.constant 0 : i32
    return %c0_i32, %c0_i32_0 : i32, i32
  }
  func.func @transform_10(%arg0: i32) -> (i32, i32) {
    %c0_i32 = arith.constant 0 : i32
    %c0_i32_0 = arith.constant 0 : i32
    %c0_i32_1 = arith.constant 0 : i32
    return %c0_i32, %c0_i32_0 : i32, i32
  }
}

</mosaic_0001>

<bundles_post_ra>
// kernel: transformer_vae_forward.2
= control target key start
LH: loop header
LB: loop body
LE: loop exit
PB: predicated region body
PF: predicated region fallthrough
CT: control target
= control target key end

     0   :  { %s1457_s30 = smov 0   ;;  %s1624_s0 = inlined_call_operand.vmem [shape: f32[2,8,32], index: 0, kind: input, shape index: {}]   ;;  %s1625_s1 = inlined_call_operand.vmem [shape: f32[2,32,96], index: 1, kind: input, shape index: {}]   ;;  %s1626_s2 = inlined_call_operand.vmem [shape: f32[2,32,32], index: 2, kind: input, shape index: {}]   ;;  %s1627_s3 = inlined_call_operand.vmem [shape: f32[2,32,64], index: 3, kind: input, shape index: {}]   ;;  %s1628_s4 = inlined_call_operand.vmem [shape: f32[2,64,32], index: 4, kind: input, shape index: {}]   ;;  %s1629_s5 = inlined_call_operand.vmem [shape: f32[2,8,96], index: 5, kind: input, shape index: {}]   ;;  %s1630_s6 = inlined_call_operand.vmem [shape: f32[32,128], index: 6, kind: input, shape index: {}]   ;;  %s1631_s7 = inlined_call_operand.vmem [shape: f32[1,128], index: 7, kind: input, shape index: {}]   ;;  %s1632_s8 = inlined_call_operand.vmem [shape: f32[2,8,32], index: 8, kind: output, shape index: {0}]   ;;  %s1633_s9 = inlined_call_operand.vmem [shape: f32[2,128], index: 9, kind: output, shape index: {1}]  }
   0x1 LB: > { %s1463_s10 = sadd.s32 4294967295, %s1397_s30   ;;  %p1178_p0 = scmp.ge.s32.totalorder %s1397_s30, 1  ;;  %s1397_s30 = sphi %s1457_s30, %s20_s30  }
   0x2   : > { %p319_p1 = scmp.lt.s32.totalorder %s1397_s30, 3 }
   0x4   : > { %p320_p2 = pnand %p1178_p0, %p319_p1 }
   0x5   : > { %p369_p3 = scmp.lt.s32.totalorder (!%p320_p2), %s1463_s10, 1  ;;  %p1188_p4 = scmp.ne.s32.totalorder (!%p320_p2), %s1463_s10, 0 }
   0x6   : > { %323 = sbr.rel (%p320_p2) target bundleno = 2347 (0x92b), region = 52 }
   0xd   : > { %s370_s11 = scalar_select %p369_p3, %s1463_s10, 1 }
   0xe   : > { %396 = sbr.rel (%p1188_p4) target bundleno = 21 (0x15), region = 56  ;;  %v397_v0 = vld [vmem:[%s1624_s0] sm:$0xff] (!%p1188_p4)  ;;  %vm399_vm0 = vcmask (!%p1188_p4), 261120   ;;  %v398_v1 = vld [vmem:[%s1624_s0 + $0x8] sm:$0xff] (!%p1188_p4) }
   0xf   : > { %s1202_s12 = sshll.u32 %s370_s11, 5  ;;  %s1205_s13 = sshll.u32 %s370_s11, 6  ;;  %400 = vst.msk [vmem:[%s1632_s8] sm:$0xff] (!%p1188_p4), %vm399_vm0, %v397_v0  ;;  %401 = vst.msk [vmem:[%s1632_s8 + $0x8] sm:$0xff] (!%p1188_p4), %vm399_vm0, %v398_v1 }
  0x10   : > { %s373_s16 = scalar_lea.vmem %s1625_s1, %s1202_s12  ;;  %s1475_s19 = scalar_lea.vmem %s1626_s2, %s1202_s12 }
  0x11   : > { %s1480_s22 = scalar_lea.vmem %s1627_s3, %s1202_s12  ;;  %s1485_s25 = scalar_lea.vmem %s1628_s4, %s1205_s13 }
  0x12   : > { %s1187_s26 = sshll.u32 %s370_s11, 3 }
  0x13   : > { %s392_s29 = scalar_lea.vmem %s1629_s5, %s1187_s26 }
  0x15 PF: > { %v405_v2 = vld [vmem:[%s373_s16] sm:$0xff]  ;;  %v406_v3 = vld [vmem:[%s373_s16 + $0x8] sm:$0xff]  ;;  %v407_v4 = vld [vmem:[%s373_s16 + $0x10] sm:$0xff]  ;;  %vm413_vm1 = vcmask 261120   ;;  %v409_v10 = vlaneseq  ;;  %s1400_s27 = smov 112   ;;  %vm500_vm2 = vcmask 130048  }
  0x16   : > { %v1302_v5 = vpack.c.bf16 %v406_v3, %v405_v2  ;;  %v408_v6 = vld [vmem:[%s373_s16 + $0x18] sm:$0xff]  ;;  %v1506_v7 = vld [vmem:[%s1632_s8] sm:$0xff]  ;;  %v1513_v9 = vld [vmem:[%s1632_s8 + $0x8] sm:$0xff]  ;;  %s1399_s16 = smov 96   ;;  %v1401_v37 = vmov 1   ;;  %v1402_v38 = vmov 0  }
  0x17   : > { %v1306_v8 = vpack.c.bf16 %v408_v6, %v407_v4  ;;  %1247 = vmatprep.mubr.msk.f32.mxu0 %vm413_vm1, %v1506_v7  ;;  %v1517_v11 = vshrl.u32 %v409_v10, 7  ;;  %v1520_v13 = vld [vmem:[%s392_s29] sm:$0xff]  ;;  %1365 = vset.pattern.permute.xlu0 %v1401_v37  ;;  %vm511_vm3 = vcmask 7168   ;;  %s1403_s28 = smov 64   ;;  %vm860_vm4 = vcmask 523264   ;;  %p1197_p5 = scmp.ne.s32.totalorder %s1463_s10, 1 }
  0x18   : > { %1303 = vmatprep.subr.bf16.mxu0 %v1302_v5  ;;  %1364 = vset.pattern.permute.xlu1 %v1402_v38  ;;  %vm1405_vm5 = vmmov (!%p1197_p5), 0   ;;  %vm1018_vm6 = vcmask (!%p1197_p5), 1041409  }
  0x19   : > { %1305 = vmatpush3.bf16.msra.mxu0 %v1302_v5  ;;  %v411_v12 = vsub.s32 0, %v1517_v11 }
  0x1a   : > { %1307 = vmatprep.subr.bf16.mxu0 %v1306_v8 }
  0x1b   : > { %v412_v14 = vrot.slane %v1520_v13, %v411_v12  ;;  %v627_v12 = vld [vmem:[%s1475_s19] sm:$0xff] }
  0x1d   : > { %1309 = vmatpush3.bf16.msra.mxu0 %v1306_v8 }
  0x20   : > { %1248 = vmatmul.mubr.msk.f32.vlgmr.msra.gmra.mrb[0].mxu0 %vm413_vm1, %v1513_v9 }
  0xf3   : > { %v1249_v15 = vpop.f32.mrb[0].mxu0 }
  0xf4   : > { %v486_v16 = vpop.f32.mrb[1].mxu0  ;;  %v1526_v18 = vadd.f32 %v1249_v15, %v412_v14 }
  0xf5   : > { %v1523_v17 = vadd.f32 %v486_v16, %v412_v14  ;;  %v628_v14 = vld [vmem:[%s1475_s19 + $0x8] sm:$0xff]  ;;  %v629_v16 = vld [vmem:[%s1475_s19 + $0x10] sm:$0xff] }
  0xf6   : > { %v1310_v15 = vpack.c.bf16 %v628_v14, %v627_v12 }
  0xf7   : > { %496 = vrot.lane.b32.xlu0 %v1523_v17, %s1399_s16 }
  0xf8   : > { %1311 = vmatprep.subr.bf16.mxu1 %v1310_v15 }
  0xf9   : > { %1313 = vmatpush3.bf16.msra.mxu1 %v1310_v15 }
  0xfb   : > { %514 = vrot.lane.b32.xlu0 %v1526_v18, %s1399_s16 }
 0x169   : > { %v497_v19 = vpop.permute.xlu0 %496 }
 0x16a   : > { %v569_v20 = vmul.f32 %v497_v19, %v1526_v18  ;;  %v499_v23 = vmul.f32 %v497_v19, %v1523_v17  ;;  %v630_v19 = vld [vmem:[%s1475_s19 + $0x18] sm:$0xff] }
 0x16c   : > { %574 = vrot.lane.b32.xlu0 %v569_v20, %s1400_s27  ;;  %v501_v26 = vsel %vm500_vm2, %v499_v23, 0.0  ;;  %v570_v27 = vsel %vm500_vm2, %v569_v20, 0.0  ;;  %v1314_v20 = vpack.c.bf16 %v630_v19, %v629_v16 }
 0x16d   : > { %v515_v21 = vpop.permute.xlu0 %514 }
 0x16e   : > { %v517_v22 = vmul.f32 %v515_v21, %v1523_v17  ;;  %v581_v24 = vmul.f32 %v515_v21, %v1526_v18  ;;  %1315 = vmatprep.subr.bf16.mxu1 %v1314_v20 }
 0x16f   : > { %1317 = vmatpush3.bf16.msra.mxu1 %v1314_v20  ;;  %v747_v20 = vsub.s32 2, %v1517_v11 }
 0x170   : > { %522 = vrot.lane.b32.xlu1 %v517_v22, %s1400_s27  ;;  %v518_v25 = vsel %vm500_vm2, %v517_v22, 0.0  ;;  %v582_v35 = vsel %vm500_vm2, %v581_v24, 0.0 }
 0x174   : > { %505 = vrot.lane.b32.xlu1 %v499_v23, %s1400_s27 }
 0x178   : > { %586 = vrot.lane.b32.xlu1 %v581_v24, %s1400_s27 }
 0x18b   : > { %519 = vadd.xlane.f32.xlu0 %v518_v25 }
 0x18f   : > { %502 = vadd.xlane.f32.xlu0 %v501_v26 }
 0x19c   : > { %571 = vadd.xlane.f32.xlu1 %v570_v27 }
 0x1de   : > { %v575_v30 = vpop.permute.xlu0 %574 }
 0x1df   : > { %v577_v33 = vsel %vm500_vm2, %v575_v30, 0.0 }
 0x1e2   : > { %v523_v28 = vpop.permute.xlu1 %522 }
 0x1e3   : > { %v525_v29 = vsel %vm500_vm2, %v523_v28, 0.0 }
 0x1e4   : > { %526 = vadd.xlane.f32.xlu0 %v525_v29 }
 0x1e6   : > { %v506_v31 = vpop.permute.xlu1 %505 }
 0x1e7   : > { %v508_v32 = vsel %vm500_vm2, %v506_v31, 0.0 }
 0x1e8   : > { %509 = vadd.xlane.f32.xlu1 %v508_v32  ;;  %578 = vadd.xlane.f32.xlu0 %v577_v33 }
 0x1ea   : > { %v587_v34 = vpop.permute.xlu1 %586 }
 0x1eb   : > { %v589_v36 = vsel %vm500_vm2, %v587_v34, 0.0 }
 0x1ec   : > { %583 = vadd.xlane.f32.xlu1 %v582_v35  ;;  %590 = vadd.xlane.f32.xlu0 %v589_v36 }
 0x218   : > { %v520_v39 = vpop.xlane.xlu0 %519 }
 0x21c   : > { %v503_v40 = vpop.xlane.xlu0 %502 }
 0x229   : > { %v572_v41 = vpop.xlane.xlu1 %571 }
 0x271   : > { %v527_v42 = vpop.xlane.xlu0 %526 }
 0x272   : > { %v528_v45 = vsel %vm511_vm3, %v520_v39, %v527_v42  ;;  %v633_v39 = vsub.s32 1, %v1517_v11 }
 0x275   : > { %v510_v43 = vpop.xlane.xlu1 %509  ;;  %v579_v44 = vpop.xlane.xlu0 %578 }
 0x276   : > { %v512_v46 = vsel %vm511_vm3, %v503_v40, %v510_v43  ;;  %v580_v52 = vsel %vm511_vm3, %v572_v41, %v579_v44  ;;  %v634_v40 = vrot.slane %v1520_v13, %v633_v39 }
 0x277   : > { %v529_v47 = vmax.f32 %v512_v46, %v528_v45 }
 0x279   : > { %v530_v48 = vsub.f32 %v512_v46, %v529_v47  ;;  %v533_v49 = vsub.f32 %v528_v45, %v529_v47  ;;  %v584_v50 = vpop.xlane.xlu1 %583  ;;  %v591_v51 = vpop.xlane.xlu0 %590 }
 0x27a   : > { %v592_v53 = vsel %vm511_vm3, %v584_v50, %v591_v51 }
 0x27b   : > { %v531_v54 = vmul.f32 1.442695, %v530_v48  ;;  %v534_v55 = vmul.f32 1.442695, %v533_v49  ;;  %v593_v56 = vmax.f32 %v580_v52, %v592_v53 }
 0x27d   : > { %1371 = vpow2.f32 %v531_v54  ;;  %v594_v57 = vsub.f32 %v580_v52, %v593_v56  ;;  %v597_v58 = vsub.f32 %v592_v53, %v593_v56 }
 0x27e   : > { %1373 = vpow2.f32 %v534_v55 }
 0x27f   : > { %v595_v59 = vmul.f32 1.442695, %v594_v57  ;;  %v598_v60 = vmul.f32 1.442695, %v597_v58  ;;  %v757_v57 = vld [vmem:[%s1480_s22] sm:$0xff]  ;;  %v758_v58 = vld [vmem:[%s1480_s22 + $0x8] sm:$0xff] }
 0x281   : > { %1375 = vpow2.f32 %v595_v59  ;;  %v1318_v59 = vpack.c.bf16 %v758_v58, %v757_v57 }
 0x282   : > { %1377 = vpow2.f32 %v598_v60  ;;  %v759_v60 = vld [vmem:[%s1480_s22 + $0x10] sm:$0xff] }
 0x283   : > { %1319 = vmatprep.subr.bf16.mxu0 %v1318_v59 }
 0x284   : > { %1321 = vmatpush3.bf16.msra.mxu0 %v1318_v59 }
 0x287   : > { %v1372_v61 = vpop.eup %1371 }
 0x288   : > { %v1374_v62 = vpop.eup %1373 }
 0x289   : > { %v536_v63 = vadd.f32 %v1374_v62, %v1372_v61 }
 0x28b   : > { %1379 = vrcp.f32 %v536_v63  ;;  %v1376_v0 = vpop.eup %1375  ;;  %v848_v63 = vld [vmem:[%s1485_s25] sm:$0xff] }
 0x28c   : > { %v1378_v1 = vpop.eup %1377 }
 0x28d   : > { %v600_v2 = vadd.f32 %v1378_v1, %v1376_v0 }
 0x28f   : > { %1381 = vrcp.f32 %v600_v2 }
 0x295   : > { %v1380_v3 = vpop.eup %1379 }
 0x296   : > { %v538_v4 = vmul.f32 %v1380_v3, %v1372_v61  ;;  %v553_v5 = vmul.f32 %v1380_v3, %v1374_v62  ;;  %v760_v61 = vld [vmem:[%s1480_s22 + $0x18] sm:$0xff] }
 0x297   : > { %v1322_v62 = vpack.c.bf16 %v760_v61, %v759_v60  ;;  %v851_v3 = vld [vmem:[%s1485_s25 + $0x18] sm:$0xff] }
 0x298   : > { %545 = vperm.xlu0 %1365, %v538_v4   ;;  %541 = vperm.xlu1 %1364, %v538_v4  }
 0x299   : > { %v1382_v6 = vpop.eup %1381  ;;  %1323 = vmatprep.subr.bf16.mxu0 %v1322_v62 }
 0x29a   : > { %v602_v8 = vmul.f32 %v1382_v6, %v1376_v0  ;;  %v614_v10 = vmul.f32 %v1382_v6, %v1378_v1  ;;  %1325 = vmatpush3.bf16.msra.mxu0 %v1322_v62  ;;  %v849_v0 = vld [vmem:[%s1485_s25 + $0x8] sm:$0xff]  ;;  %v850_v1 = vld [vmem:[%s1485_s25 + $0x10] sm:$0xff] }
 0x29b   : > { %v1326_v2 = vpack.c.bf16 %v849_v0, %v848_v63  ;;  %v1330_v4 = vpack.c.bf16 %v851_v3, %v850_v1  ;;  %v853_v6 = vld [vmem:[%s1485_s25 + $0x28] sm:$0xff]  ;;  %v972_v1 = vsub.s32 6, %v1517_v11 }
 0x29c   : > { %556 = vperm.xlu1 %1364, %v553_v5  }
 0x29d   : > { %1327 = vmatprep.subr.bf16.mxu1 %v1326_v2  ;;  %v973_v3 = vrot.slane %v1520_v13, %v972_v1 }
 0x2a0   : > { %1366 = vset.pattern.permute.xlu1 %v1401_v37 }
 0x2a1   : > { %560 = vperm.xlu1 %1366, %v553_v5   ;;  %v852_v5 = vld [vmem:[%s1485_s25 + $0x20] sm:$0xff] }
 0x2a5   : > { %1367 = vset.pattern.permute.xlu1 %v1402_v38 }
 0x2a6   : > { %605 = vperm.xlu1 %1367, %v602_v8  }
 0x2aa   : > { %1368 = vset.pattern.permute.xlu1 %v1401_v37 }
 0x2ab   : > { %609 = vperm.xlu1 %1368, %v602_v8   ;;  %v1334_v8 = vpack.c.bf16 %v853_v6, %v852_v5 }
 0x2af   : > { %1369 = vset.pattern.permute.xlu1 %v1402_v38 }
 0x2b0   : > { %617 = vperm.xlu1 %1369, %v614_v10  }
 0x2b4   : > { %1370 = vset.pattern.permute.xlu1 %v1401_v37 }
 0x2b5   : > { %621 = vperm.xlu1 %1370, %v614_v10  }
 0x2b9   : > { %549 = vrot.lane.b32.xlu1 %v1523_v17, %s1403_s28 }
 0x2bd   : > { %564 = vrot.lane.b32.xlu1 %v1526_v18, %s1403_s28 }
 0x317   : > { %v542_v21 = vpop.permute.xlu1 %541  ;;  %v546_v29 = vpop.permute.xlu0 %545 }
 0x318   : > { %v548_v17 = vsel %vm500_vm2, %v542_v21, %v546_v29  ;;  %v753_v21 = vsub.s32 3, %v1517_v11 }
 0x31b   : > { %v557_v22 = vpop.permute.xlu1 %556 }
 0x320   : > { %v561_v23 = vpop.permute.xlu1 %560 }
 0x321   : > { %v563_v30 = vsel %vm500_vm2, %v557_v22, %v561_v23  ;;  %v748_v22 = vrot.slane %v1520_v13, %v747_v20  ;;  %v1404_v20 = vmov (!%p1197_p5), 0.0|0.0  }
 0x322   : > { %1342 = vmatprep.subr.bf16.mxu0 (!%p1197_p5), %v1404_v20 }
 0x325   : > { %v606_v24 = vpop.permute.xlu1 %605 }
 0x32a   : > { %v610_v25 = vpop.permute.xlu1 %609 }
 0x32b   : > { %v612_v31 = vsel %vm500_vm2, %v606_v24, %v610_v25  ;;  %v754_v25 = vrot.slane %v1520_v13, %v753_v21 }
 0x32f   : > { %v618_v26 = vpop.permute.xlu1 %617 }
 0x334   : > { %v622_v27 = vpop.permute.xlu1 %621 }
 0x335   : > { %v624_v32 = vsel %vm500_vm2, %v618_v26, %v622_v27 }
 0x338   : > { %v550_v28 = vpop.permute.xlu1 %549 }
 0x339   : > { %v552_v33 = vmul.f32 %v550_v28, %v548_v17  ;;  %v613_v34 = vmul.f32 %v612_v31, %v550_v28  ;;  %v854_v31 = vld [vmem:[%s1485_s25 + $0x30] sm:$0xff] }
 0x33c   : > { %v565_v18 = vpop.permute.xlu1 %564 }
 0x33d   : > { %v567_v35 = vmul.f32 %v565_v18, %v563_v30  ;;  %v625_v36 = vmul.f32 %v624_v32, %v565_v18  ;;  %v855_v32 = vld [vmem:[%s1485_s25 + $0x38] sm:$0xff] }
 0x33e   : > { %v1338_v18 = vpack.c.bf16 %v855_v32, %v854_v31 }
 0x33f   : > { %v626_v37 = vadd.f32 %v625_v36, %v613_v34  ;;  %v568_v38 = vadd.f32 %v567_v35, %v552_v33  ;;  %v763_v33 = vsub.s32 4, %v1517_v11 }
 0x341   : > { %1258 = vmatprep.mubr.msk.f32.mxu1 %vm413_vm1, %v568_v38  ;;  %v764_v34 = vrot.slane %v1520_v13, %v763_v33 }
 0x342   : > { %1259 = vmatmul.mubr.msk.f32.vlgmr.msra.gmra.mrb[0].mxu1 %vm413_vm1, %v626_v37 }
 0x343   : > { %1329 = vmatpush3.bf16.msra.mxu1 %v1326_v2  ;;  %v978_v2 = vsub.s32 7, %v1517_v11 }
 0x344   : > { %1331 = vmatprep.subr.bf16.mxu1 %v1330_v4 }
 0x345   : > { %v979_v6 = vrot.slane %v1520_v13, %v978_v2 }
 0x347   : > { %1333 = vmatpush3.bf16.msra.mxu1 %v1330_v4 }
 0x348   : > { %1335 = vmatprep.subr.bf16.mxu1 %v1334_v8 }
 0x34b   : > { %1337 = vmatpush3.bf16.msra.mxu1 %v1334_v8 }
 0x34c   : > { %1339 = vmatprep.subr.bf16.mxu1 %v1338_v18 }
 0x34f   : > { %1341 = vmatpush3.bf16.msra.mxu1 %v1338_v18 }
 0x415   : > { %v1260_v41 = vpop.f32.mrb[0].mxu1 }
 0x416   : > { %v713_v42 = vadd.f32 %v1260_v41, %v634_v40  ;;  %v707_v43 = vpop.f32.mrb[1].mxu1  ;;  %v858_v41 = vsub.s32 5, %v1517_v11  ;;  %v1005_v11 = vld [vmem:[%s1630_s6] sm:$0xff] (!%p1197_p5) }
 0x417   : > { %v708_v44 = vadd.f32 %v707_v43, %v634_v40 }
 0x418   : > { %v717_v45 = vadd.f32 %v713_v42, %v1513_v9  ;;  %v859_v42 = vrot.slane %v1520_v13, %v858_v41  ;;  %v1006_v13 = vld [vmem:[%s1630_s6 + $0x8] sm:$0xff] (!%p1197_p5) }
 0x419   : > { %v716_v46 = vadd.f32 %v708_v44, %v1506_v7  ;;  %v1343_v21 = vpack.c.bf16 (!%p1197_p5), %v1006_v13, %v1005_v11 }
 0x41a   : > { %v721_v47 = vsel %vm413_vm1, %v717_v45, 0.0 }
 0x41b   : > { %722 = vadd.xlane.f32.xlu1 %v721_v47  ;;  %v718_v48 = vsel %vm413_vm1, %v716_v46, 0.0 }
 0x41c   : > { %719 = vadd.xlane.f32.xlu0 %v718_v48 }
 0x4a8   : > { %v723_v49 = vpop.xlane.xlu1 %722 }
 0x4a9   : > { %v726_v50 = vmul.f32 0.03125, %v723_v49  ;;  %v720_v51 = vpop.xlane.xlu0 %719 }
 0x4aa   : > { %v725_v52 = vmul.f32 0.03125, %v720_v51 }
 0x4ab   : > { %v728_v53 = vsub.f32 %v717_v45, %v726_v50 }
 0x4ac   : > { %v727_v54 = vsub.f32 %v716_v46, %v725_v52 }
 0x4ad   : > { %v730_v9 = vmul.f32 %v728_v53, %v728_v53 }
 0x4ae   : > { %v729_v55 = vmul.f32 %v727_v54, %v727_v54 }
 0x4af   : > { %v734_v56 = vsel %vm413_vm1, %v730_v9, 0.0 }
 0x4b0   : > { %v731_v7 = vsel %vm413_vm1, %v729_v55, 0.0 }
 0x4b1   : > { %732 = vadd.xlane.f32.xlu0 %v731_v7 }
 0x4b5   : > { %735 = vadd.xlane.f32.xlu0 %v734_v56 }
 0x53e   : > { %v733_v10 = vpop.xlane.xlu0 %732 }
 0x53f   : > { %v737_v12 = vmul.f32 0.03125, %v733_v10 }
 0x541   : > { %v739_v14 = vadd.f32 1e-05, %v737_v12 }
 0x542   : > { %v736_v15 = vpop.xlane.xlu0 %735 }
 0x543   : > { %1383 = vrsqrt.f32 %v739_v14  ;;  %v738_v16 = vmul.f32 0.03125, %v736_v15 }
 0x545   : > { %v740_v19 = vadd.f32 1e-05, %v738_v16 }
 0x547   : > { %1385 = vrsqrt.f32 %v740_v19  ;;  %v1007_v19 = vld [vmem:[%s1630_s6 + $0x10] sm:$0xff] (!%p1197_p5) }
 0x54d   : > { %v1384_v23 = vpop.eup %1383 }
 0x54e   : > { %v743_v24 = vmul.f32 %v1384_v23, %v727_v54  ;;  %v1406_v23 = vmov (!%p1197_p5), 0.0  }
 0x550   : > { %v749_v26 = vmul.f32 %v748_v22, %v743_v24 }
 0x551   : > { %v1386_v27 = vpop.eup %1385 }
 0x552   : > { %v744_v28 = vmul.f32 %v1386_v27, %v728_v53  ;;  %v755_v29 = vadd.f32 %v754_v25, %v749_v26 }
 0x554   : > { %v750_v17 = vmul.f32 %v748_v22, %v744_v28  ;;  %1269 = vmatprep.mubr.msk.f32.mxu0 %vm413_vm1, %v755_v29  ;;  %v1008_v22 = vld [vmem:[%s1630_s6 + $0x18] sm:$0xff] (!%p1197_p5) }
 0x555   : > { %v1346_v28 = vpack.c.bf16 (!%p1197_p5), %v1008_v22, %v1007_v19 }
 0x556   : > { %v756_v30 = vadd.f32 %v754_v25, %v750_v17 }
 0x558   : > { %1270 = vmatmul.mubr.msk.f32.vlgmr.msra.gmra.mrb[2].mxu0 %vm413_vm1, %v756_v30 }
 0x559   : > { %1299 = vmatprep.mubr.msk.f32.mxu0 (!%p1197_p5), %vm1405_vm5, %v1406_v23  ;;  %1344 = vmatpush3.bf16.msra.mxu0 (!%p1197_p5), %v1343_v21 }
 0x55a   : > { %1345 = vmatprep.subr.bf16.mxu0 (!%p1197_p5), %v1404_v20 }
 0x55d   : > { %1347 = vmatpush3.bf16.msra.mxu0 (!%p1197_p5), %v1346_v28 }
 0x62b   : > { %v1271_v35 = vpop.f32.mrb[2].mxu0 }
 0x62c   : > { %v843_v36 = vadd.f32 %v1271_v35, %v764_v34  ;;  %v837_v37 = vpop.f32.mrb[3].mxu0 }
 0x62d   : > { %v838_v38 = vadd.f32 %v837_v37, %v764_v34 }
 0x62e   : > { %v847_v40 = vmax.f32 %v843_v36, 0.0 }
 0x62f   : > { %v846_v39 = vmax.f32 %v838_v38, 0.0 }
 0x631   : > { %1288 = vmatprep.mubr.msk.f32.mxu1 %vm860_vm4, %v846_v39 }
 0x632   : > { %1289 = vmatmul.mubr.msk.f32.vlgmr.msra.gmra.mrb[2].mxu1 %vm860_vm4, %v847_v40  ;;  %v1198_v40 = vld [vmem:[%s1631_s7] ss:$0 sm:$0xff] (!%p1197_p5) }
 0x705   : > { %v1290_v43 = vpop.f32.mrb[2].mxu1 }
 0x706   : > { %v939_v44 = vadd.f32 %v1290_v43, %v859_v42  ;;  %v933_v45 = vpop.f32.mrb[3].mxu1 }
 0x707   : > { %v934_v46 = vadd.f32 %v933_v45, %v859_v42 }
 0x708   : > { %v943_v47 = vadd.f32 %v939_v44, %v756_v30 }
 0x709   : > { %v942_v48 = vadd.f32 %v934_v46, %v755_v29 }
 0x70a   : > { %v947_v49 = vsel %vm413_vm1, %v943_v47, 0.0 }
 0x70b   : > { %948 = vadd.xlane.f32.xlu0 %v947_v49  ;;  %v944_v50 = vsel %vm413_vm1, %v942_v48, 0.0 }
 0x70c   : > { %945 = vadd.xlane.f32.xlu1 %v944_v50 }
 0x798   : > { %v949_v51 = vpop.xlane.xlu0 %948 }
 0x799   : > { %v951_v52 = vmul.f32 0.03125, %v949_v51  ;;  %v946_v53 = vpop.xlane.xlu1 %945 }
 0x79a   : > { %v950_v54 = vmul.f32 0.03125, %v946_v53 }
 0x79b   : > { %v953_v55 = vsub.f32 %v943_v47, %v951_v52 }
 0x79c   : > { %v952_v7 = vsub.f32 %v942_v48, %v950_v54 }
 0x79d   : > { %v955_v9 = vmul.f32 %v953_v55, %v953_v55 }
 0x79e   : > { %v954_v56 = vmul.f32 %v952_v7, %v952_v7 }
 0x79f   : > { %v959_v57 = vsel %vm413_vm1, %v955_v9, 0.0 }
 0x7a0   : > { %960 = vadd.xlane.f32.xlu0 %v959_v57  ;;  %v956_v58 = vsel %vm413_vm1, %v954_v56, 0.0 }
 0x7a1   : > { %957 = vadd.xlane.f32.xlu1 %v956_v58 }
 0x82d   : > { %v961_v59 = vpop.xlane.xlu0 %960 }
 0x82e   : > { %v963_v60 = vmul.f32 0.03125, %v961_v59  ;;  %v958_v61 = vpop.xlane.xlu1 %957 }
 0x82f   : > { %v962_v62 = vmul.f32 0.03125, %v958_v61 }
 0x830   : > { %v965_v63 = vadd.f32 1e-05, %v963_v60 }
 0x831   : > { %v964_v0 = vadd.f32 1e-05, %v962_v62 }
 0x832   : > { %1387 = vrsqrt.f32 %v965_v63 }
 0x833   : > { %1389 = vrsqrt.f32 %v964_v0 }
 0x83c   : > { %v1388_v4 = vpop.eup %1387 }
 0x83d   : > { %v1390_v5 = vpop.eup %1389  ;;  %v969_v8 = vmul.f32 %v1388_v4, %v953_v55 }
 0x83e   : > { %v968_v10 = vmul.f32 %v1390_v5, %v952_v7  ;;  %987 = sbr.rel (%p1197_p5) target bundleno = 2347 (0x92b), region = 60 }
 0x83f   : > { %v975_v12 = vmul.f32 %v973_v3, %v969_v8 }
 0x840   : > { %v974_v14 = vmul.f32 %v973_v3, %v968_v10 }
 0x841   : > { %v981_v15 = vadd.f32 %v979_v6, %v975_v12 }
 0x842   : > { %v980_v16 = vadd.f32 %v979_v6, %v974_v14 }
 0x843   : > { %983 = vst.msk [vmem:[%s1632_s8 + $0x8] sm:$0xff] %vm413_vm1, %v981_v15  ;;  %v995_v25 = vsel (!%p1197_p5), %vm413_vm1, %v981_v15, 0.0 }
 0x844   : > { %982 = vst.msk [vmem:[%s1632_s8] sm:$0xff] %vm413_vm1, %v980_v16  ;;  %v988_v24 = vsel (!%p1197_p5), %vm413_vm1, %v980_v16, 0.0  ;;  %v996_v27 = vrot.slane (!%p1197_p5), %v995_v25, 4 }
 0x845   : > { %v989_v26 = vrot.slane %v988_v24, 4 }
 0x846   : > { %v997_v17 = vadd.f32 %v996_v27, %v995_v25 }
 0x847   : > { %v990_v29 = vadd.f32 %v989_v26, %v988_v24 }
 0x848   : > { %v998_v31 = vrot.slane %v997_v17, 2 }
 0x849   : > { %v991_v30 = vrot.slane %v990_v29, 2 }
 0x84a   : > { %v999_v18 = vadd.f32 %v998_v31, %v997_v17 }
 0x84b   : > { %v992_v32 = vadd.f32 %v991_v30, %v990_v29 }
 0x84c   : > { %v1000_v34 = vrot.slane %v999_v18, 1 }
 0x84d   : > { %v993_v33 = vrot.slane %v992_v32, 1 }
 0x84e   : > { %v1001_v36 = vadd.f32 %v1000_v34, %v999_v18 }
 0x84f   : > { %v994_v35 = vadd.f32 %v993_v33, %v992_v32 }
 0x850   : > { %v1004_v38 = vmul.f32 0.125, %v1001_v36 }
 0x851   : > { %v1003_v37 = vmul.f32 0.125, %v994_v35 }
 0x853   : > { %v1019_v39 = vsel %vm1018_vm6, %v1004_v38, %v1003_v37 }
 0x854   : > { %1300 = vmatmul.mubr.msk.f32.vlgmr.msra.gmra.mrb[0].mxu0 %vm413_vm1, %v1019_v39 }
 0x927   : > { %v1088_v41 = vpop.f32.mrb[0].mxu0 }
 0x928   : > { %v1089_v42 = vadd.f32 %v1198_v40, %v1088_v41  ;;  %v1301_v43 = vpop.f32.mrb[1].mxu0 }
 0x92a   : > { %1092 = vst [vmem:[%s1633_s9] sm:$0x3] %v1089_v42 }
 0x92b PF: > { %s20_s30 = sadd.s32 1, %s1397_s30  }
 0x92c   : > { %p17_p6 = scmp.ge.s32.totalorder %s20_s30, 4  }
 0x92e   :  { %19 = sbr.rel (!%p17_p6) target bundleno = 1 (0x1), region = 106 }

// kernel: transformer_vae_forward.3
= control target key start
LH: loop header
LB: loop body
LE: loop exit
PB: predicated region body
PF: predicated region fallthrough
CT: control target
= control target key end

     0   :  { %s1902_s13 = smov 0   ;;  %s2135_s0 = inlined_call_operand.vmem [shape: f32[2,16], index: 0, kind: input, shape index: {}]   ;;  %s2136_s1 = inlined_call_operand.vmem [shape: f32[2,8,32], index: 1, kind: input, shape index: {}]   ;;  %s2137_s2 = inlined_call_operand.vmem [shape: f32[16,32], index: 2, kind: input, shape index: {}]   ;;  %s2138_s3 = inlined_call_operand.vmem [shape: f32[1,32], index: 3, kind: input, shape index: {}]   ;;  %s2139_s4 = inlined_call_operand.vmem [shape: f32[2,32,192], index: 4, kind: input, shape index: {}]   ;;  %s2140_s5 = inlined_call_operand.vmem [shape: f32[2,32,64], index: 5, kind: input, shape index: {}]   ;;  %s2141_s6 = inlined_call_operand.vmem [shape: f32[2,64,32], index: 6, kind: input, shape index: {}]   ;;  %s2142_s7 = inlined_call_operand.vmem [shape: f32[2,13,64], index: 7, kind: input, shape index: {}]   ;;  %s2143_s8 = inlined_call_operand.vmem [shape: f32[32,128], index: 8, kind: input, shape index: {}]   ;;  %s2144_s9 = inlined_call_operand.vmem [shape: f32[1,128], index: 9, kind: input, shape index: {}]   ;;  %s2145_s10 = inlined_call_operand.vmem [shape: f32[2,128], index: 10, kind: output, shape index: {}]  }
   0x1 LB: > { %s1908_s14 = sadd.s32 4294967295, %s1830_s13   ;;  %p1493_p0 = scmp.ge.s32.totalorder %s1830_s13, 1  ;;  %s1830_s13 = sphi %s1902_s13, %s20_s13  }
   0x2   : > { %p337_p1 = scmp.lt.s32.totalorder %s1830_s13, 3 }
   0x4   : > { %p338_p2 = pnand %p1493_p0, %p337_p1 }
   0x5   : > { %p385_p3 = scmp.lt.s32.totalorder (!%p338_p2), %s1908_s14, 1  ;;  %p1502_p4 = scmp.ne.s32.totalorder (!%p338_p2), %s1908_s14, 0 }
   0x6   : > { %341 = sbr.rel (%p338_p2) target bundleno = 3177 (0xc69), region = 60 }
   0xd   : > { %s386_s15 = scalar_select %p385_p3, %s1908_s14, 1 }
   0xe   : > { %408 = sbr.rel (%p1502_p4) target bundleno = 235 (0xeb), region = 64  ;;  %v410_v0 = vld [vmem:[%s2137_s2] sm:$0xff] (!%p1502_p4)  ;;  %v411_v1 = vld [vmem:[%s2137_s2 + $0x8] sm:$0xff] (!%p1502_p4)  ;;  %v1832_v2 = vmov (!%p1502_p4), 0.0|0.0   ;;  %vm1833_vm0 = vmmov (!%p1502_p4), 0   ;;  %v1834_v4 = vmov (!%p1502_p4), 0.0  }
   0xf   : > { %s1518_s16 = sshll.u32 %s386_s15, 6  ;;  %s1519_s17 = sshll.u32 %s386_s15, 5  ;;  %1673 = vmatprep.subr.bf16.mxu0 (!%p1502_p4), %v1832_v2  ;;  %v1674_v3 = vpack.c.bf16 (!%p1502_p4), %v411_v1, %v410_v0  ;;  %1574 = vmatprep.mubr.msk.f32.mxu0 (!%p1502_p4), %vm1833_vm0, %v1834_v4  ;;  %v409_v5 = vld [vmem:[%s2135_s0] sm:$0x3] (!%p1502_p4)  ;;  %vm419_vm1 = vcmask (!%p1502_p4), 130048   ;;  %vm493_vm2 = vcmask (!%p1502_p4), 254976  }
  0x10   : > { %s1917_s20 = scalar_lea.vmem %s2139_s4, %s1518_s16  ;;  %s1922_s23 = scalar_lea.vmem %s2140_s5, %s1519_s17  ;;  %v1503_v6 = vld [vmem:[%s2138_s3] ss:$0 sm:$0xff] (!%p1502_p4) }
  0x11   : > { %s1927_s26 = scalar_lea.vmem %s2141_s6, %s1518_s16  ;;  %s1521_s27 = sshll.u32 %s386_s15, 4  ;;  %1675 = vmatpush3.bf16.msra.mxu0 (!%p1502_p4), %v1674_v3 }
  0x12   : > { %s1932_s30 = scalar_lea.vmem %s2142_s7, %s1521_s27 }
  0x14   : > { %1575 = vmatmul.mubr.msk.f32.vlgmr.msra.gmra.mrb[0].mxu0 (!%p1502_p4), %vm419_vm1, %v409_v5 }
  0xe7   : > { %v489_v7 = vpop.f32.mrb[0].mxu0 }
  0xe8   : > { %v490_v8 = vadd.f32 %v1503_v6, %v489_v7  ;;  %v1576_v9 = vpop.f32.mrb[1].mxu0 }
  0xea   : > { %494 = vst.msk [vmem:[#allocation2] sm:$0x3] %vm493_vm2, %v490_v8 }
  0xeb PF: > { %v495_v10 = vld [vmem:[%s1917_s20] sm:$0xff]  ;;  %v1949_v11 = vld [vmem:[%s1917_s20 + $0x10] sm:$0xff]  ;;  %v1835_v13 = vmov 0.0|0.0   ;;  %vm1836_vm3 = vmmov 0   ;;  %v1837_v16 = vmov 0.0   ;;  %s1838_s22 = smov 96   ;;  %v506_v29 = vlaneseq }
  0xec   : > { %v499_v12 = vld [vmem:[%s1917_s20 + $0x20] sm:$0xff]  ;;  %1676 = vmatprep.subr.bf16.mxu1 %v1835_v13  ;;  %v1677_v14 = vpack.c.bf16 %v1949_v11, %v495_v10  ;;  %v501_v15 = vld [vmem:[%s1917_s20 + $0x30] sm:$0xff]  ;;  %1585 = vmatprep.mubr.msk.f32.mxu1 %vm1836_vm3, %v1837_v16  ;;  %v1755_v17 = vpack.i.bf16 %v1949_v11, %v495_v10  ;;  %vm510_vm4 = vcmask 261120   ;;  %vm679_vm5 = vcmask 254976   ;;  %v1987_v44 = vld [vmem:[%s1917_s20 + $0x8] sm:$0xff]  ;;  %s1839_s24 = smov 32  }
  0xed   : > { %v1680_v18 = vpack.c.bf16 %v501_v15, %v499_v12  ;;  %v1760_v19 = vpack.i.bf16 %v501_v15, %v499_v12  ;;  %v1967_v30 = vshrl.u32 %v506_v29, 7  ;;  %v1973_v32 = vld [vmem:[%s1932_s30] sm:$0xff]  ;;  %v1765_v45 = vpack.i.bf16 %v1987_v44, %v495_v10  ;;  %v1991_v46 = vld [vmem:[%s1917_s20 + $0x28] sm:$0xff]  ;;  %s1840_s25 = smov 64   ;;  %v1995_v48 = vld [vmem:[%s1917_s20 + $0x38] sm:$0xff]  ;;  %s1841_s11 = smov 112  }
  0xee   : > { %1678 = vmatpush3.bf16.msra.mxu1 %v1677_v14  ;;  %1756 = vrot.lane.b32.xlu0 %v1755_v17, %s1838_s22  ;;  %v1780_v47 = vpack.i.bf16 %v1991_v46, %v499_v12  ;;  %v1785_v49 = vpack.i.bf16 %v1995_v48, %v501_v15  ;;  %v2001_v60 = vld [vmem:[%s1917_s20 + $0x18] sm:$0xff]  ;;  %v704_v10 = vld [vmem:[%s2136_s1] sm:$0xff]  ;;  %v705_v29 = vld [vmem:[%s2136_s1 + $0x8] sm:$0xff]  ;;  %vm913_vm6 = vcmask 130048   ;;  %vm924_vm7 = vcmask 7168   ;;  %p1513_p5 = scmp.ne.s32.totalorder %s1908_s14, 1 }
  0xef   : > { %1679 = vmatprep.subr.bf16.mxu1 %v1835_v13  ;;  %v1970_v31 = vsub.s32 0, %v1967_v30  ;;  %v1981_v37 = vsub.s32 1, %v1967_v30  ;;  %v1770_v61 = vpack.i.bf16 %v2001_v60, %v1949_v11  ;;  %1607 = vmatprep.mubr.msk.f32.mxu0 %vm510_vm4, %v704_v10  ;;  %vm926_vm8 = vcmask 15360  }
  0xf0   : > { %vm968_vm9 = vcmask 253952   ;;  %vm1233_vm10 = vcmask 523264   ;;  %vm1845_vm11 = vmmov (!%p1513_p5), 0  }
  0xf1   : > { %v505_v20 = vld [vmem:[#allocation2] sm:$0x3]  ;;  %v509_v33 = vrot.slane %v1973_v32, %v1970_v31  ;;  %v677_v38 = vrot.slane %v1973_v32, %v1981_v37 }
  0xf2   : > { %1681 = vmatpush3.bf16.msra.mxu1 %v1680_v18  ;;  %1761 = vrot.lane.b32.xlu0 %v1760_v19, %s1838_s22 }
  0xf3   : > { %1682 = vmatprep.subr.bf16.mxu1 %v1835_v13 }
  0xf5   : > { %1586 = vmatmul.mubr.msk.f32.vlgmr.msra.gmra.mrb[0].mxu1 %vm510_vm4, %v505_v20 }
  0xf6   : > { %1596 = vmatprep.mubr.msk.f32.mxu1 %vm1836_vm3, %v1837_v16  ;;  %1766 = vrot.lane.b32.xlu0 %v1765_v45, %s1839_s24 }
  0xfa   : > { %1776 = vrot.lane.b32.xlu0 %v1755_v17, %s1840_s25 }
  0xfe   : > { %1781 = vrot.lane.b32.xlu0 %v1780_v47, %s1839_s24 }
 0x102   : > { %1786 = vrot.lane.b32.xlu0 %v1785_v49, %s1839_s24 }
 0x106   : > { %1791 = vrot.lane.b32.xlu0 %v1760_v19, %s1840_s25 }
 0x160   : > { %v1757_v21 = vpop.permute.xlu0 %1756 }
 0x161   : > { %v1759_v22 = vunpack.i.h.bf16 %v1757_v21  ;;  %v1758_v23 = vunpack.i.l.bf16 %v1757_v21 }
 0x163   : > { %v1683_v24 = vpack.c.bf16 %v1759_v22, %v1758_v23 }
 0x164   : > { %v1762_v25 = vpop.permute.xlu0 %1761 }
 0x165   : > { %v1764_v26 = vunpack.i.h.bf16 %v1762_v25  ;;  %v1763_v27 = vunpack.i.l.bf16 %v1762_v25  ;;  %1684 = vmatpush3.bf16.msra.mxu1 %v1683_v24  ;;  %v696_v25 = vsub.s32 2, %v1967_v30 }
 0x166   : > { %1685 = vmatprep.subr.bf16.mxu1 %v1835_v13 }
 0x167   : > { %v1686_v28 = vpack.c.bf16 %v1764_v26, %v1763_v27  ;;  %v701_v26 = vsub.s32 3, %v1967_v30  ;;  %v697_v27 = vrot.slane %v1973_v32, %v696_v25 }
 0x168   : > { %v1767_v50 = vpop.permute.xlu0 %1766 }
 0x169   : > { %1687 = vmatpush3.bf16.msra.mxu1 %v1686_v28  ;;  %v1769_v15 = vunpack.i.h.bf16 %v1767_v50  ;;  %v1768_v17 = vunpack.i.l.bf16 %v1767_v50 }
 0x16a   : > { %1696 = vmatprep.subr.bf16.mxu1 %v1835_v13 }
 0x16b   : > { %v730_v22 = vsel %vm510_vm4, %v1768_v17, %v1769_v15 }
 0x16c   : > { %v1777_v53 = vpop.permute.xlu0 %1776 }
 0x16d   : > { %v1779_v54 = vunpack.i.h.bf16 %v1777_v53  ;;  %v1778_v55 = vunpack.i.l.bf16 %v1777_v53 }
 0x16f   : > { %v1697_v57 = vpack.c.bf16 %v1779_v54, %v1778_v55 }
 0x170   : > { %v1782_v62 = vpop.permute.xlu0 %1781 }
 0x171   : > { %v1784_v0 = vunpack.i.h.bf16 %v1782_v62  ;;  %v1783_v1 = vunpack.i.l.bf16 %v1782_v62 }
 0x173   : > { %v732_v4 = vsel %vm510_vm4, %v1783_v1, %v1784_v0  ;;  %v1843_v0 = vmov 0  }
 0x174   : > { %v1787_v63 = vpop.permute.xlu0 %1786  ;;  %1795 = vset.pattern.permute.xlu0 %v1843_v0 }
 0x175   : > { %v1789_v2 = vunpack.i.h.bf16 %v1787_v63  ;;  %v1788_v3 = vunpack.i.l.bf16 %v1787_v63  ;;  %v1842_v63 = vmov 1  }
 0x176   : > { %1796 = vset.pattern.permute.xlu1 %v1842_v63 }
 0x177   : > { %v733_v5 = vsel %vm510_vm4, %v1788_v3, %v1789_v2 }
 0x178   : > { %v1692_v6 = vpack.c.bf16 %v733_v5, %v732_v4  ;;  %v1792_v7 = vpop.permute.xlu0 %1791 }
 0x179   : > { %v1794_v8 = vunpack.i.h.bf16 %v1792_v7  ;;  %v1793_v9 = vunpack.i.l.bf16 %v1792_v7 }
 0x17b   : > { %v1700_v11 = vpack.c.bf16 %v1794_v8, %v1793_v9 }
 0x1c8   : > { %v580_v34 = vpop.f32.mrb[0].mxu1 }
 0x1c9   : > { %v581_v35 = vadd.f32 %v580_v34, %v509_v33  ;;  %v1587_v36 = vpop.f32.mrb[1].mxu1  ;;  %v702_v34 = vrot.slane %v1973_v32, %v701_v26 }
 0x1cb   : > { %1597 = vmatmul.mubr.msk.f32.vlgmr.msra.gmra.mrb[2].mxu1 %vm510_vm4, %v581_v35 }
 0x1cc   : > { %1618 = vmatprep.mubr.msk.f32.mxu1 %vm1836_vm3, %v1837_v16  ;;  %1698 = vmatpush3.bf16.msra.mxu1 %v1697_v57 }
 0x1cd   : > { %1699 = vmatprep.subr.bf16.mxu1 %v1835_v13 }
 0x1d0   : > { %1701 = vmatpush3.bf16.msra.mxu1 %v1700_v11 }
 0x1d1   : > { %1708 = vmatprep.subr.bf16.mxu1 %v1835_v13 }
 0x29e   : > { %v669_v39 = vpop.f32.mrb[2].mxu1 }
 0x29f   : > { %v673_v40 = vadd.f32 %v669_v39, %v505_v20  ;;  %v1598_v41 = vpop.f32.mrb[3].mxu1  ;;  %v821_v39 = vsub.s32 4, %v1967_v30 }
 0x2a1   : > { %v678_v42 = vadd.f32 %v677_v38, %v673_v40  ;;  %v708_v38 = vsub.s32 5, %v1967_v30 }
 0x2a3   : > { %v680_v43 = vsel %vm679_vm5, %v678_v42, 0.0  ;;  %v709_v41 = vrot.slane %v1973_v32, %v708_v38 }
 0x2a4   : > { %681 = vadd.xlane.f32.xlu1 %v680_v43 }
 0x331   : > { %v682_v51 = vpop.xlane.xlu1 %681 }
 0x332   : > { %v684_v52 = vmul.f32 0.03125, %v682_v51 }
 0x334   : > { %v685_v56 = vsub.f32 %v678_v42, %v684_v52  ;;  %v822_v42 = vrot.slane %v1973_v32, %v821_v39 }
 0x336   : > { %v686_v58 = vmul.f32 %v685_v56, %v685_v56 }
 0x338   : > { %v687_v59 = vsel %vm679_vm5, %v686_v58, 0.0 }
 0x339   : > { %688 = vadd.xlane.f32.xlu1 %v687_v59 }
 0x34a   : > { %1771 = vrot.lane.b32.xlu1 %v1770_v61, %s1839_s24 }
 0x3c6   : > { %v689_v12 = vpop.xlane.xlu1 %688 }
 0x3c7   : > { %v690_v14 = vmul.f32 0.03125, %v689_v12 }
 0x3c9   : > { %v691_v18 = vadd.f32 1e-05, %v690_v14 }
 0x3ca   : > { %v1772_v19 = vpop.permute.xlu1 %1771 }
 0x3cb   : > { %1810 = vrsqrt.f32 %v691_v18  ;;  %v1774_v20 = vunpack.i.h.bf16 %v1772_v19  ;;  %v1773_v21 = vunpack.i.l.bf16 %v1772_v19 }
 0x3cd   : > { %v731_v23 = vsel %vm510_vm4, %v1773_v21, %v1774_v20 }
 0x3ce   : > { %v1688_v24 = vpack.c.bf16 %v731_v23, %v730_v22 }
 0x3d0   : > { %1689 = vmatprep.subr.bf16.mxu0 %v1688_v24 }
 0x3d1   : > { %1691 = vmatpush3.bf16.msra.mxu0 %v1688_v24 }
 0x3d2   : > { %1693 = vmatprep.subr.bf16.mxu0 %v1692_v6 }
 0x3d5   : > { %v1811_v28 = vpop.eup %1810  ;;  %1695 = vmatpush3.bf16.msra.mxu0 %v1692_v6 }
 0x3d6   : > { %v693_v33 = vmul.f32 %v1811_v28, %v685_v56  ;;  %1702 = vmatprep.subr.bf16.mxu0 %v1835_v13 }
 0x3d8   : > { %1608 = vmatmul.mubr.msk.f32.vlgmr.msra.gmra.mrb[0].mxu0 %vm510_vm4, %v705_v29  ;;  %v698_v35 = vmul.f32 %v697_v27, %v693_v33 }
 0x3d9   : > { %1629 = vmatprep.mubr.msk.f32.mxu0 %vm1836_vm3, %v1837_v16 }
 0x3da   : > { %v2029_v36 = vadd.f32 %v702_v34, %v698_v35 }
 0x3dc   : > { %1619 = vmatmul.mubr.msk.f32.vlgmr.msra.gmra.mrb[4].mxu1 %vm510_vm4, %v2029_v36 }
 0x3dd   : > { %1640 = vmatprep.mubr.msk.f32.mxu1 %vm1836_vm3, %v1837_v16 }
 0x4ab   : > { %v1609_v40 = vpop.f32.mrb[0].mxu0 }
 0x4ac   : > { %v810_v43 = vpop.f32.mrb[1].mxu0  ;;  %v2041_v47 = vadd.f32 %v1609_v40, %v709_v41 }
 0x4ad   : > { %v2043_v50 = vadd.f32 %v810_v43, %v709_v41 }
 0x4af   : > { %v904_v45 = vpop.f32.mrb[4].mxu1 }
 0x4b0   : > { %v905_v49 = vadd.f32 %v904_v45, %v822_v42  ;;  %v1620_v51 = vpop.f32.mrb[5].mxu1 }
 0x4b2   : > { %v911_v52 = vrot.slane %v905_v49, %v1970_v31  ;;  %v973_v53 = vrot.slane %v905_v49, %v1981_v37 }
 0x4b4   : > { %v912_v54 = vmul.f32 %v911_v52, %v2043_v50  ;;  %v974_v55 = vmul.f32 %v973_v53, %v2041_v47 }
 0x4b6   : > { %979 = vrot.lane.b32.xlu0 %v974_v55, %s1841_s11  ;;  %918 = vrot.lane.b32.xlu1 %v912_v54, %s1841_s11  ;;  %v914_v56 = vsel %vm913_vm6, %v912_v54, 0.0  ;;  %v975_v62 = vsel %vm913_vm6, %v974_v55, 0.0 }
 0x4da   : > { %915 = vadd.xlane.f32.xlu1 %v914_v56 }
 0x528   : > { %v980_v57 = vpop.permute.xlu0 %979  ;;  %v919_v58 = vpop.permute.xlu1 %918 }
 0x529   : > { %v921_v59 = vsel %vm913_vm6, %v919_v58, 0.0  ;;  %v982_v61 = vsel %vm913_vm6, %v980_v57, 0.0 }
 0x52a   : > { %922 = vadd.xlane.f32.xlu0 %v921_v59  ;;  %983 = vadd.xlane.f32.xlu1 %v982_v61  ;;  %v1799_v61 = vpack.i.bf16 %v2001_v60, %v1987_v44 }
 0x52e   : > { %976 = vadd.xlane.f32.xlu0 %v975_v62  ;;  %v1804_v62 = vpack.i.bf16 %v1995_v48, %v1991_v46 }
 0x567   : > { %v916_v1 = vpop.xlane.xlu1 %915 }
 0x5b7   : > { %v923_v2 = vpop.xlane.xlu0 %922  ;;  %v984_v6 = vpop.xlane.xlu1 %983 }
 0x5b8   : > { %v925_v3 = vsel %vm924_vm7, %v916_v1, %v923_v2 }
 0x5b9   : > { %v927_v4 = vsel %vm926_vm8, %v925_v3, -inf }
 0x5ba   : > { %v928_v5 = vrot.slane %v927_v4, 4 }
 0x5bb   : > { %v977_v7 = vpop.xlane.xlu0 %976 }
 0x5bc   : > { %v929_v8 = vmax.f32 %v927_v4, %v928_v5  ;;  %v985_v9 = vsel %vm924_vm7, %v977_v7, %v984_v6 }
 0x5bd   : > { %v986_v10 = vsel %vm926_vm8, %v985_v9, -inf }
 0x5be   : > { %v930_v11 = vrot.slane %v929_v8, 2  ;;  %v987_v12 = vrot.slane %v986_v10, 4 }
 0x5c0   : > { %v931_v14 = vmax.f32 %v929_v8, %v930_v11  ;;  %v988_v15 = vmax.f32 %v986_v10, %v987_v12 }
 0x5c2   : > { %v932_v17 = vrot.slane %v931_v14, 1  ;;  %v989_v18 = vrot.slane %v988_v15, 2 }
 0x5c4   : > { %v933_v19 = vmax.f32 %v931_v14, %v932_v17  ;;  %v990_v20 = vmax.f32 %v988_v15, %v989_v18 }
 0x5c6   : > { %v934_v21 = vsub.f32 %v925_v3, %v933_v19  ;;  %v991_v22 = vrot.slane %v990_v20, 1 }
 0x5c8   : > { %v935_v23 = vmul.f32 1.442695, %v934_v21  ;;  %v992_v24 = vmax.f32 %v990_v20, %v991_v22 }
 0x5ca   : > { %1812 = vpow2.f32 %v935_v23  ;;  %v993_v27 = vsub.f32 %v985_v9, %v992_v24 }
 0x5cc   : > { %v994_v28 = vmul.f32 1.442695, %v993_v27 }
 0x5ce   : > { %1814 = vpow2.f32 %v994_v28 }
 0x5d4   : > { %v1813_v29 = vpop.eup %1812 }
 0x5d5   : > { %v937_v33 = vsel %vm926_vm8, %v1813_v29, 0.0 }
 0x5d6   : > { %v938_v34 = vrot.slane %v937_v33, 4 }
 0x5d8   : > { %v1815_v35 = vpop.eup %1814  ;;  %v939_v38 = vadd.f32 %v938_v34, %v937_v33  ;;  %v1117_v33 = vsub.s32 6, %v1967_v30 }
 0x5d9   : > { %v996_v40 = vsel %vm926_vm8, %v1815_v35, 0.0 }
 0x5da   : > { %v940_v41 = vrot.slane %v939_v38, 2  ;;  %v997_v42 = vrot.slane %v996_v40, 4  ;;  %v1118_v34 = vrot.slane %v1973_v32, %v1117_v33 }
 0x5dc   : > { %v941_v43 = vadd.f32 %v940_v41, %v939_v38  ;;  %v998_v45 = vadd.f32 %v997_v42, %v996_v40 }
 0x5de   : > { %v942_v49 = vrot.slane %v941_v43, 1  ;;  %v999_v51 = vrot.slane %v998_v45, 2 }
 0x5e0   : > { %v943_v52 = vadd.f32 %v942_v49, %v941_v43  ;;  %v1000_v53 = vadd.f32 %v999_v51, %v998_v45 }
 0x5e2   : > { %1816 = vrcp.f32 %v943_v52  ;;  %v1001_v54 = vrot.slane %v1000_v53, 1  ;;  %v1143_v52 = vld [vmem:[%s1922_s23] sm:$0xff] }
 0x5e4   : > { %v1002_v55 = vadd.f32 %v1001_v54, %v1000_v53  ;;  %v1145_v54 = vld [vmem:[%s1922_s23 + $0x10] sm:$0xff] }
 0x5e6   : > { %1818 = vrcp.f32 %v1002_v55  ;;  %v1146_v55 = vld [vmem:[%s1922_s23 + $0x18] sm:$0xff] }
 0x5ec   : > { %v1817_v56 = vpop.eup %1816 }
 0x5ed   : > { %v945_v57 = vmul.f32 %v1817_v56, %v1813_v29  ;;  %v1712_v56 = vpack.c.bf16 %v1146_v55, %v1145_v54 }
 0x5ef   : > { %952 = vperm.xlu1 %1796, %v945_v57   ;;  %948 = vperm.xlu0 %1795, %v945_v57   ;;  %v1225_v57 = vld [vmem:[%s1927_s26] sm:$0xff] }
 0x5f0   : > { %v1819_v58 = vpop.eup %1818 }
 0x5f1   : > { %v1004_v59 = vmul.f32 %v1819_v58, %v1815_v35  ;;  %v1226_v58 = vld [vmem:[%s1927_s26 + $0x8] sm:$0xff] }
 0x5f3   : > { %1797 = vset.pattern.permute.xlu1 %v1843_v0  ;;  %1809 = vset.pattern.permute.xlu0 %v1842_v63 }
 0x5f4   : > { %1007 = vperm.xlu1 %1797, %v1004_v59  }
 0x5f8   : > { %1798 = vset.pattern.permute.xlu1 %v1842_v63 }
 0x5f9   : > { %1011 = vperm.xlu1 %1798, %v1004_v59   ;;  %v1227_v59 = vld [vmem:[%s1927_s26 + $0x10] sm:$0xff] }
 0x5fd   : > { %957 = vrot.lane.b32.xlu1 %v2043_v50, %s1838_s22 }
 0x601   : > { %1016 = vrot.lane.b32.xlu1 %v2041_v47, %s1838_s22 }
 0x605   : > { %1800 = vrot.lane.b32.xlu1 %v1799_v61, %s1838_s22  ;;  %v1715_v61 = vpack.c.bf16 %v1226_v58, %v1225_v57 }
 0x609   : > { %1805 = vrot.lane.b32.xlu1 %v1804_v62, %s1838_s22  ;;  %v1228_v62 = vld [vmem:[%s1927_s26 + $0x18] sm:$0xff] }
 0x66e   : > { %v953_v0 = vpop.permute.xlu1 %952  ;;  %v949_v2 = vpop.permute.xlu0 %948 }
 0x66f   : > { %v955_v3 = vsel %vm913_vm6, %v949_v2, %v953_v0  ;;  %v1718_v0 = vpack.c.bf16 %v1228_v62, %v1227_v59 }
 0x673   : > { %v1008_v1 = vpop.permute.xlu1 %1007 }
 0x678   : > { %v1012_v63 = vpop.permute.xlu1 %1011 }
 0x679   : > { %v1014_v44 = vsel %vm913_vm6, %v1008_v1, %v1012_v63  ;;  %v1229_v1 = vld [vmem:[%s1927_s26 + $0x20] sm:$0xff]  ;;  %v1230_v63 = vld [vmem:[%s1927_s26 + $0x28] sm:$0xff] }
 0x67a   : > { %v1721_v2 = vpack.c.bf16 %v1230_v63, %v1229_v1 }
 0x67c   : > { %v958_v50 = vpop.permute.xlu1 %957 }
 0x67d   : > { %v960_v4 = vmul.f32 %v958_v50, %v955_v3 }
 0x67f   : > { %v961_v47 = vsel %vm510_vm4, %v960_v4, 0.0 }
 0x680   : > { %v962_v5 = vrot.slane %v961_v47, 4  ;;  %v1017_v60 = vpop.permute.xlu1 %1016 }
 0x681   : > { %v1019_v6 = vmul.f32 %v1017_v60, %v1014_v44 }
 0x682   : > { %v963_v7 = vadd.f32 %v962_v5, %v961_v47  ;;  %v1135_v47 = vsub.s32 7, %v1967_v30  ;;  %v504_v5 = vld [vmem:[%s1932_s30 + $0x8] sm:$0x1f]  ;;  %v1343_v30 = vld [vmem:[%s2143_s8 + $0x10] sm:$0xff] (!%p1513_p5) }
 0x683   : > { %v1020_v46 = vsel %vm510_vm4, %v1019_v6, 0.0  ;;  %v1141_v6 = vrot.slane %v504_v5, %v1970_v31  ;;  %v1311_v31 = vrot.slane %v504_v5, %v696_v25  ;;  %v1329_v25 = vrot.slane %v504_v5, %v701_v26  ;;  %v1342_v26 = vld [vmem:[%s2143_s8 + $0x8] sm:$0xff] (!%p1513_p5) }
 0x684   : > { %v964_v48 = vrot.slane %v963_v7, 2  ;;  %v1021_v8 = vrot.slane %v1020_v46, 4  ;;  %v1801_v9 = vpop.permute.xlu1 %1800  ;;  %v1136_v44 = vrot.slane %v1973_v32, %v1135_v47 }
 0x685   : > { %v1803_v10 = vunpack.i.h.bf16 %v1801_v9  ;;  %v1802_v11 = vunpack.i.l.bf16 %v1801_v9  ;;  %v1232_v9 = vld [vmem:[%s1927_s26 + $0x38] sm:$0xff] }
 0x686   : > { %v965_v12 = vadd.f32 %v964_v48, %v963_v7  ;;  %v1022_v14 = vadd.f32 %v1021_v8, %v1020_v46  ;;  %v1231_v8 = vld [vmem:[%s1927_s26 + $0x30] sm:$0xff] }
 0x687   : > { %v1703_v15 = vpack.c.bf16 %v1803_v10, %v1802_v11  ;;  %v1150_v10 = vrot.slane %v504_v5, %v1981_v37 }
 0x688   : > { %v966_v17 = vrot.slane %v965_v12, 1  ;;  %v1023_v18 = vrot.slane %v1022_v14, 2  ;;  %v1806_v19 = vpop.permute.xlu1 %1805 }
 0x689   : > { %v1808_v20 = vunpack.i.h.bf16 %v1806_v19  ;;  %v1807_v21 = vunpack.i.l.bf16 %v1806_v19  ;;  %1704 = vmatpush3.bf16.msra.mxu0 %v1703_v15 }
 0x68a   : > { %v967_v22 = vadd.f32 %v966_v17, %v965_v12  ;;  %v1024_v23 = vadd.f32 %v1023_v18, %v1022_v14  ;;  %1705 = vmatprep.subr.bf16.mxu0 %v1835_v13 }
 0x68b   : > { %v1706_v24 = vpack.c.bf16 %v1808_v20, %v1807_v21 }
 0x68c   : > { %969 = vst.msk [vmem:[#allocation3] sm:$0x1] %vm968_vm9, %v967_v22  ;;  %v1025_v27 = vrot.slane %v1024_v23, 1 }
 0x68d   : > { %1707 = vmatpush3.bf16.msra.mxu0 %v1706_v24 }
 0x68e   : > { %v1026_v28 = vadd.f32 %v1025_v27, %v1024_v23  ;;  %1714 = vmatprep.subr.bf16.mxu0 %v1835_v13 }
 0x690   : > { %1027 = vst.msk [vmem:[#allocation3 + $0x1] sm:$0x1] %vm968_vm9, %v1026_v28 }
 0x697   : > { %v1028_v29 = vld [vmem:[#allocation3] sm:$0x3] }
 0x698   : > { %1630 = vmatmul.mubr.msk.f32.vlgmr.msra.gmra.mrb[2].mxu0 %vm510_vm4, %v1028_v29 }
 0x699   : > { %1659 = vmatprep.mubr.msk.f32.mxu0 %vm1836_vm3, %v1837_v16  ;;  %1716 = vmatpush3.bf16.msra.mxu0 %v1715_v61 }
 0x69a   : > { %1717 = vmatprep.subr.bf16.mxu0 %v1835_v13 }
 0x69d   : > { %1719 = vmatpush3.bf16.msra.mxu0 %v1718_v0 }
 0x69e   : > { %1720 = vmatprep.subr.bf16.mxu0 %v1835_v13 }
 0x6a1   : > { %1722 = vmatpush3.bf16.msra.mxu0 %v1721_v2 }
 0x6a2   : > { %1723 = vmatprep.subr.bf16.mxu0 %v1835_v13 }
 0x76b   : > { %v1110_v35 = vpop.f32.mrb[2].mxu0 }
 0x76c   : > { %v1114_v38 = vadd.f32 %v1110_v35, %v2029_v36  ;;  %v1631_v40 = vpop.f32.mrb[3].mxu0  ;;  %v1144_v36 = vld [vmem:[%s1922_s23 + $0x8] sm:$0xff] }
 0x76d   : > { %v1709_v53 = vpack.c.bf16 %v1144_v36, %v1143_v52 }
 0x76e   : > { %v1119_v41 = vadd.f32 %v1118_v34, %v1114_v38  ;;  %v1334_v34 = vrot.slane %v504_v5, %v821_v39  ;;  %v1844_v39 = vmov (!%p1513_p5), 0.0|0.0  }
 0x76f   : > { %1710 = vmatpush3.bf16.msra.mxu1 %v1709_v53 }
 0x770   : > { %v1120_v42 = vsel %vm679_vm5, %v1119_v41, 0.0  ;;  %1711 = vmatprep.subr.bf16.mxu1 %v1835_v13  ;;  %v1724_v13 = vpack.c.bf16 %v1232_v9, %v1231_v8 }
 0x771   : > { %1121 = vadd.xlane.f32.xlu1 %v1120_v42 }
 0x772   : > { %1725 = vmatpush3.bf16.msra.mxu0 %v1724_v13 }
 0x773   : > { %1713 = vmatpush3.bf16.msra.mxu1 %v1712_v56  ;;  %1726 = vmatprep.subr.bf16.mxu0 (!%p1513_p5), %v1844_v39 }
 0x7fe   : > { %v1122_v43 = vpop.xlane.xlu1 %1121 }
 0x7ff   : > { %v1123_v45 = vmul.f32 0.03125, %v1122_v43  ;;  %v1344_v43 = vld [vmem:[%s2143_s8 + $0x18] sm:$0xff] (!%p1513_p5) }
 0x801   : > { %v1124_v16 = vsub.f32 %v1119_v41, %v1123_v45  ;;  %v1341_v41 = vld [vmem:[%s2143_s8] sm:$0xff] (!%p1513_p5)  ;;  %v1846_v45 = vmov (!%p1513_p5), 0.0  }
 0x802   : > { %v1727_v42 = vpack.c.bf16 (!%p1513_p5), %v1342_v26, %v1341_v41 }
 0x803   : > { %v1125_v49 = vmul.f32 %v1124_v16, %v1124_v16 }
 0x805   : > { %v1126_v51 = vsel %vm679_vm5, %v1125_v49, 0.0  ;;  %v1514_v49 = vld [vmem:[%s2144_s9] ss:$0 sm:$0xff] (!%p1513_p5) }
 0x806   : > { %1127 = vadd.xlane.f32.xlu0 %v1126_v51 }
 0x893   : > { %v1128_v3 = vpop.xlane.xlu0 %1127 }
 0x894   : > { %v1129_v50 = vmul.f32 0.03125, %v1128_v3 }
 0x896   : > { %v1130_v4 = vadd.f32 1e-05, %v1129_v50 }
 0x898   : > { %1820 = vrsqrt.f32 %v1130_v4 }
 0x8a2   : > { %v1821_v60 = vpop.eup %1820 }
 0x8a3   : > { %v1132_v7 = vmul.f32 %v1821_v60, %v1124_v16  ;;  %v1730_v16 = vpack.c.bf16 (!%p1513_p5), %v1344_v43, %v1343_v30 }
 0x8a5   : > { %v1137_v46 = vmul.f32 %v1136_v44, %v1132_v7 }
 0x8a7   : > { %v1142_v48 = vadd.f32 %v1141_v6, %v1137_v46 }
 0x8a9   : > { %1641 = vmatmul.mubr.msk.f32.vlgmr.msra.gmra.mrb[6].mxu1 %vm510_vm4, %v1142_v48 }
 0x97c   : > { %v1220_v11 = vpop.f32.mrb[6].mxu1 }
 0x97d   : > { %v1221_v12 = vadd.f32 %v1220_v11, %v1150_v10  ;;  %v1642_v14 = vpop.f32.mrb[7].mxu1 }
 0x97f   : > { %v1224_v15 = vmax.f32 %v1221_v12, 0.0 }
 0x981   : > { %1660 = vmatmul.mubr.msk.f32.vlgmr.msra.gmra.mrb[4].mxu0 %vm1233_vm10, %v1224_v15 }
 0x982   : > { %1670 = vmatprep.mubr.msk.f32.mxu0 (!%p1513_p5), %vm1845_vm11, %v1846_v45  ;;  %1728 = vmatpush3.bf16.msra.mxu0 (!%p1513_p5), %v1727_v42 }
 0x983   : > { %1729 = vmatprep.subr.bf16.mxu0 (!%p1513_p5), %v1844_v39 }
 0x986   : > { %1731 = vmatpush3.bf16.msra.mxu0 (!%p1513_p5), %v1730_v16 }
 0xa54   : > { %v1303_v32 = vpop.f32.mrb[4].mxu0 }
 0xa55   : > { %v1307_v17 = vadd.f32 %v1303_v32, %v1142_v48  ;;  %v1661_v18 = vpop.f32.mrb[5].mxu0 }
 0xa57   : > { %v1312_v19 = vadd.f32 %v1311_v31, %v1307_v17 }
 0xa59   : > { %v1313_v20 = vsel %vm679_vm5, %v1312_v19, 0.0 }
 0xa5a   : > { %1314 = vadd.xlane.f32.xlu0 %v1313_v20 }
 0xae7   : > { %v1315_v21 = vpop.xlane.xlu0 %1314 }
 0xae8   : > { %v1316_v22 = vmul.f32 0.03125, %v1315_v21 }
 0xaea   : > { %v1317_v23 = vsub.f32 %v1312_v19, %v1316_v22 }
 0xaec   : > { %v1318_v37 = vmul.f32 %v1317_v23, %v1317_v23 }
 0xaee   : > { %v1319_v24 = vsel %vm679_vm5, %v1318_v37, 0.0 }
 0xaef   : > { %1320 = vadd.xlane.f32.xlu0 %v1319_v24 }
 0xb7c   : > { %v1321_v27 = vpop.xlane.xlu0 %1320 }
 0xb7d   : > { %v1322_v28 = vmul.f32 0.03125, %v1321_v27 }
 0xb7f   : > { %v1323_v29 = vadd.f32 1e-05, %v1322_v28 }
 0xb81   : > { %1822 = vrsqrt.f32 %v1323_v29 }
 0xb8b   : > { %v1823_v33 = vpop.eup %1822 }
 0xb8c   : > { %v1325_v35 = vmul.f32 %v1823_v33, %v1317_v23  ;;  %1340 = sbr.rel (%p1513_p5) target bundleno = 3177 (0xc69), region = 68 }
 0xb8e   : > { %v1330_v38 = vmul.f32 %v1329_v25, %v1325_v35 }
 0xb90   : > { %v1335_v40 = vadd.f32 %v1334_v34, %v1330_v38 }
 0xb92   : > { %1336 = vst.msk [vmem:[#allocation2] sm:$0x3] %vm679_vm5, %v1335_v40  ;;  %1671 = vmatmul.mubr.msk.f32.vlgmr.msra.gmra.mrb[0].mxu0 (!%p1513_p5), %vm510_vm4, %v1335_v40 }
 0xc65   : > { %v1421_v51 = vpop.f32.mrb[0].mxu0 }
 0xc66   : > { %v1422_v52 = vadd.f32 %v1514_v49, %v1421_v51  ;;  %v1672_v36 = vpop.f32.mrb[1].mxu0 }
 0xc68   : > { %1425 = vst [vmem:[%s2145_s10] sm:$0x3] %v1422_v52 }
 0xc69 PF: > { %s20_s13 = sadd.s32 1, %s1830_s13  }
 0xc6a   : > { %p17_p6 = scmp.ge.s32.totalorder %s20_s13, 4  }
 0xc6c   :  { %19 = sbr.rel (!%p17_p6) target bundleno = 1 (0x1), region = 103 }

</bundles_post_ra>
